<compile_context>
chip_gen: v6e
topology: v6e:2x2x1
jax: 0.10.0
libtpu: 0.0.40
codegen_flags: <defaults>
</compile_context>

<pallas_src>
import jax
import jax.numpy as jnp
from jax.experimental import pallas as pl
from jax.experimental.pallas import tpu as pltpu

# ----- small, fixed problem sizes (consistent with the module's forward) -----
N, CIN, H, W = 2, 4, 16, 16       # batch, input channels, spatial
F = 32                            # features_size of the (synthetic) encoder
KH = KW = 3
PAD = 1                           # conv padding
HW = H * W
LANES = N * HW                    # batch folded into the lane axis -> 512
HOUT = 8                          # fused head rows: 2 cls + 4 box + 2 zero pad
CAUG = CIN + 1                    # input channels + ones row (bias fold)
CTR = PAD * KW + PAD              # center-tap index (dy=dx=0)


def _tap_shift(t):
    dh, dw = divmod(t, KW)
    return (dh - PAD) * W + (dw - PAD)


def mapnet_kernel(x_ref, we_ref, wh_ref, addh_ref, mask_ref, out_ref):
    x = x_ref[...]                       # (CAUG, LANES)
    masks = mask_ref[...]                # (9, LANES)

    # ---- encoder conv3x3 + ReLU: 9 per-tap GEMMs on lane-rolled inputs -----
    # A tap at offset s = dy*W + dx is a circular roll by -s of the flat lane
    # axis; the per-tap mask zeroes the wrapped / cross-image / out-of-bounds
    # lanes, so the result equals the zero-padded conv.  The mask is applied
    # to the small (CAUG, LANES) input (cheaper than the (F, LANES) partial).
    # The encoder bias rides in the ones channel of the center tap's weights.
    enc = jnp.dot(we_ref[CTR], x, preferred_element_type=jnp.float32)
    for t in range(KH * KW):
        s = _tap_shift(t)
        if s == 0:
            continue
        tap = pltpu.roll(x, shift=(-s) % LANES, axis=1) * masks[t:t + 1, :]
        enc = enc + jnp.dot(we_ref[t], tap, preferred_element_type=jnp.float32)
    enc = jnp.maximum(enc, 0.0)          # (F, LANES)

    # ---- fused heads (2 cls + 4 box + 2 pad): 9 per-tap GEMMs --------------
    # Mask is diagonal on the lane axis, so applying it to the (8, LANES)
    # partial result is algebraically identical and 4x cheaper than masking
    # the (F, LANES) input.  addh carries conv biases + pos-mask + zero rows.
    acc = addh_ref[...] + jnp.dot(wh_ref[CTR], enc,
                                  preferred_element_type=jnp.float32)
    for t in range(KH * KW):
        s = _tap_shift(t)
        if s == 0:
            continue
        part = jnp.dot(wh_ref[t], pltpu.roll(enc, shift=(-s) % LANES, axis=1),
                       preferred_element_type=jnp.float32)
        acc = acc + part * masks[t:t + 1, :]

    # ---- Softmax2d over the 2 class rows: explicit row ops (no sublane
    # reduce); exp on EUP, reciprocal on EUP, rest pure VALU. -----------------
    c0 = acc[0:1, :]
    c1 = acc[1:2, :]
    e = jnp.exp(acc[0:2, :] - jnp.maximum(c0, c1))            # (2, LANES)
    cls = e * pl.reciprocal(e[0:1, :] + e[1:2, :], approx=False)

    # ---- fused lane-dense (HOUT, HW) slab per image (256-lane aligned) -----
    for n in range(N):
        lo, hi = n * HW, (n + 1) * HW
        out_ref[n, 0:2, :] = cls[:, lo:hi]
        out_ref[n, 2:HOUT, :] = acc[2:HOUT, lo:hi]


def prepare_mapnet_params(params):
    """One-time, parameter-only prep (hoisted out of the per-call path)."""
    ew, eb, cw, cb, bw, bb = params

    # Encoder per-tap weights (9, F, CIN+1); the bias is folded into the
    # extra ones-channel column of the center tap.
    we_taps = ew.reshape(KH * KW, CIN, F).transpose(0, 2, 1)        # (9,F,CIN)
    bias_col = jnp.zeros((KH * KW, F, 1), jnp.float32)
    bias_col = bias_col.at[CTR, :, 0].set(eb.reshape(F))
    we_aug = jnp.concatenate([we_taps, bias_col], axis=-1)          # (9,F,CAUG)

    # Fused head per-tap weights: rows 0:2 cls conv, 2:6 bbox conv, 6:8 zero.
    hw_full = jnp.concatenate(
        [cw, bw, jnp.zeros((KH, KW, F, HOUT - 6), jnp.float32)], axis=-1)
    wh_taps = hw_full.reshape(KH * KW, F, HOUT).transpose(0, 2, 1)  # (9,8,F)

    # Additive constant: conv biases + pos-mask on bbox chans 0,1 + zero rows.
    idx = jnp.arange(HW, dtype=jnp.float32)
    posx = jnp.mod(idx, W) / W
    posy = idx / (W * H)
    zero = jnp.zeros((HW,), jnp.float32)
    pos = jnp.tile(jnp.stack([posx, posy, zero, zero], axis=0), (1, N))
    addh = jnp.concatenate([
        jnp.broadcast_to(cb.reshape(2, 1), (2, LANES)),
        bb.reshape(4, 1) + pos,
        jnp.zeros((HOUT - 6, LANES), jnp.float32),
    ], axis=0)                                                      # (8,LANES)

    # Per-tap in-bounds masks; they also kill cross-image and circular-wrap
    # lanes of the in-kernel rolls, so the roll+mask taps equal a padded conv.
    yy = jnp.arange(H).reshape(H, 1)
    xx = jnp.arange(W).reshape(1, W)
    mrows = []
    for dh in range(KH):
        for dw in range(KW):
            dy, dx = dh - PAD, dw - PAD
            ok = ((yy + dy >= 0) & (yy + dy < H) &
                  (xx + dx >= 0) & (xx + dx < W))
            mrows.append(jnp.tile(ok.reshape(1, HW).astype(jnp.float32),
                                  (1, N)))
    masks = jnp.concatenate(mrows, axis=0)                          # (9,LANES)
    return we_aug, wh_taps, addh, masks


@jax.jit
def mapnet_forward(x_nchw, prepped):
    we_aug, wh_taps, addh, masks = prepped
    x = x_nchw.astype(jnp.float32)

    # (N,CIN,H,W) -> (CIN, N*HW) with a constant ones row for the bias fold.
    x_flat = x.transpose(1, 0, 2, 3).reshape(CIN, LANES)
    x_aug = jnp.concatenate(
        [x_flat, jnp.ones((1, LANES), jnp.float32)], axis=0)        # (CAUG,512)

    out = pl.pallas_call(
        mapnet_kernel,
        out_shape=jax.ShapeDtypeStruct((N, HOUT, HW), jnp.float32),
        grid_spec=pltpu.PrefetchScalarGridSpec(
            num_scalar_prefetch=0,
            grid=(1,),                    # whole problem in one step; batch is
            in_specs=[                    # folded into the 512-lane axis
                pl.BlockSpec((CAUG, LANES), lambda i: (0, 0)),
                pl.BlockSpec((KH * KW, F, CAUG), lambda i: (0, 0, 0)),
                pl.BlockSpec((KH * KW, HOUT, F), lambda i: (0, 0, 0)),
                pl.BlockSpec((HOUT, LANES), lambda i: (0, 0)),
                pl.BlockSpec((KH * KW, LANES), lambda i: (0, 0)),
            ],
            out_specs=pl.BlockSpec((N, HOUT, HW), lambda i: (0, 0, 0)),
        ),
        compiler_params=pltpu.CompilerParams(
            dimension_semantics=("arbitrary",)),
    )(x_aug, we_aug, wh_taps, addh, masks)

    # free channel split / reshape back to NCHW (few-KiB XLA slices)
    pts = out[:, 0:2, :].reshape(N, 2, H, W)
    box = out[:, 2:6, :].reshape(N, 4, H, W)
    return pts, box


def ref_forward(x_nchw, params):
    """Pure-JAX reference of the same forward, for correctness checking."""
    ew, eb, cw, cb, bw, bb = params
    x = jnp.transpose(x_nchw, (0, 2, 3, 1)).astype(jnp.float32)

    def conv3x3(inp, w, b):
        xp = jnp.pad(inp, ((0, 0), (PAD, PAD), (PAD, PAD), (0, 0)))
        out = jnp.zeros(inp.shape[:3] + (w.shape[-1],), jnp.float32)
        for dh in range(KH):
            for dw in range(KW):
                out = out + jnp.einsum('nhwc,cf->nhwf',
                                       xp[:, dh:dh + H, dw:dw + W, :], w[dh, dw])
        return out + b.reshape(1, 1, 1, -1)

    enc = jnp.maximum(conv3x3(x, ew, eb), 0.0)
    pts = jax.nn.softmax(conv3x3(enc, cw, cb), axis=-1)
    box = conv3x3(enc, bw, bb)
    idx = jnp.arange(HW).reshape(H, W)
    px = (idx % W).astype(jnp.float32) / W
    py = idx.astype(jnp.float32) / (W * H)
    box = box.at[..., 0].add(px).at[..., 1].add(py)
    return jnp.transpose(pts, (0, 3, 1, 2)), jnp.transpose(box, (0, 3, 1, 2))


if __name__ == "__main__":
    key = jax.random.PRNGKey(0)
    k_x, k_ew, k_eb, k_cw, k_cb, k_bw, k_bb = jax.random.split(key, 7)

    x = jax.random.normal(k_x, (N, CIN, H, W), jnp.float32)

    # deterministic parameter init (HWIO conv weights, row-vector biases)
    params = (
        jax.random.normal(k_ew, (KH, KW, CIN, F), jnp.float32) * 0.1,
        jax.random.normal(k_eb, (1, F), jnp.float32) * 0.1,
        jax.random.normal(k_cw, (KH, KW, F, 2), jnp.float32) * 0.1,
        jax.random.normal(k_cb, (1, 2), jnp.float32) * 0.1,
        jax.random.normal(k_bw, (KH, KW, F, 4), jnp.float32) * 0.1,
        jax.random.normal(k_bb, (1, 4), jnp.float32) * 0.1,
    )

    prepped = prepare_mapnet_params(params)       # one-time, param-only prep

    points, bboxes = mapnet_forward(x, prepped)
    jax.block_until_ready((points, bboxes))

    points_ref, bboxes_ref = ref_forward(x, params)
    assert points.shape == (N, 2, H, W) and bboxes.shape == (N, 4, H, W)
    assert jnp.allclose(points, points_ref, atol=2e-4, rtol=2e-4)
    assert jnp.allclose(bboxes, bboxes_ref, atol=2e-4, rtol=2e-4)

    print("KERNEL_OK")
</pallas_src>

<mosaic_0001>
module attributes {stable_mosaic.version = 11 : i64} {
  func.func @mapnet_kernel(%arg0: i32, %arg1: memref<5x512xf32, #tpu.memory_space<vmem>>, %arg2: memref<9x32x5xf32, #tpu.memory_space<vmem>>, %arg3: memref<9x8x32xf32, #tpu.memory_space<vmem>>, %arg4: memref<8x512xf32, #tpu.memory_space<vmem>>, %arg5: memref<9x512xf32, #tpu.memory_space<vmem>>, %arg6: memref<2x8x256xf32, #tpu.memory_space<vmem>>) attributes {dimension_semantics = [#tpu.dimension_semantics<arbitrary>], iteration_bounds = array<i64: 1>, scalar_prefetch = 0 : i64, scratch_operands = 0 : i64, tpu.core_type = #tpu.core_type<tc>, window_params = [{pipeline_mode = #tpu.pipeline_mode<synchronous>, transform_indices = @transform_0, window_bounds = array<i64: 5, 512>}, {pipeline_mode = #tpu.pipeline_mode<synchronous>, transform_indices = @transform_1, window_bounds = array<i64: 9, 32, 5>}, {pipeline_mode = #tpu.pipeline_mode<synchronous>, transform_indices = @transform_2, window_bounds = array<i64: 9, 8, 32>}, {pipeline_mode = #tpu.pipeline_mode<synchronous>, transform_indices = @transform_3, window_bounds = array<i64: 8, 512>}, {pipeline_mode = #tpu.pipeline_mode<synchronous>, transform_indices = @transform_4, window_bounds = array<i64: 9, 512>}, {pipeline_mode = #tpu.pipeline_mode<synchronous>, transform_indices = @transform_5, window_bounds = array<i64: 2, 8, 256>}]} {
    %c0 = arith.constant 0 : index
    %c0_0 = arith.constant 0 : index
    %0 = vector.load %arg1[%c0, %c0_0] : memref<5x512xf32, #tpu.memory_space<vmem>>, vector<5x512xf32>
    %c0_1 = arith.constant 0 : index
    %c0_2 = arith.constant 0 : index
    %1 = vector.load %arg5[%c0_1, %c0_2] : memref<9x512xf32, #tpu.memory_space<vmem>>, vector<9x512xf32>
    %c4 = arith.constant 4 : index
    %c0_3 = arith.constant 0 : index
    %c0_4 = arith.constant 0 : index
    %2 = vector.load %arg2[%c4, %c0_3, %c0_4] : memref<9x32x5xf32, #tpu.memory_space<vmem>>, vector<1x32x5xf32>
    %3 = vector.shape_cast %2 : vector<1x32x5xf32> to vector<32x5xf32>
    %cst = arith.constant dense<0.000000e+00> : vector<32x512xf32>
    %4 = tpu.matmul %3, %0, %cst {dimension_numbers = #tpu.dot_dimension_numbers<[1], [0], [0], [1], [0, 0, 1, 1], [], []>} : vector<32x5xf32>, vector<5x512xf32>, vector<32x512xf32> -> vector<32x512xf32>
    %c17_i32 = arith.constant 17 : i32
    %5 = tpu.dynamic_rotate %0 by %c17_i32 dim 1 : vector<5x512xf32>, i32 -> vector<5x512xf32>
    %6 = vector.extract_strided_slice %1 {offsets = [0, 0], sizes = [1, 512], strides = [1, 1]} : vector<9x512xf32> to vector<1x512xf32>
    %7 = vector.broadcast %6 : vector<1x512xf32> to vector<5x512xf32>
    %8 = arith.mulf %5, %7 : vector<5x512xf32>
    %c0_5 = arith.constant 0 : index
    %c0_6 = arith.constant 0 : index
    %c0_7 = arith.constant 0 : index
    %9 = vector.load %arg2[%c0_5, %c0_6, %c0_7] : memref<9x32x5xf32, #tpu.memory_space<vmem>>, vector<1x32x5xf32>
    %10 = vector.shape_cast %9 : vector<1x32x5xf32> to vector<32x5xf32>
    %cst_8 = arith.constant dense<0.000000e+00> : vector<32x512xf32>
    %11 = tpu.matmul %10, %8, %cst_8 {dimension_numbers = #tpu.dot_dimension_numbers<[1], [0], [0], [1], [0, 0, 1, 1], [], []>} : vector<32x5xf32>, vector<5x512xf32>, vector<32x512xf32> -> vector<32x512xf32>
    %12 = arith.addf %4, %11 : vector<32x512xf32>
    %c16_i32 = arith.constant 16 : i32
    %13 = tpu.dynamic_rotate %0 by %c16_i32 dim 1 : vector<5x512xf32>, i32 -> vector<5x512xf32>
    %14 = vector.extract_strided_slice %1 {offsets = [1, 0], sizes = [1, 512], strides = [1, 1]} : vector<9x512xf32> to vector<1x512xf32>
    %15 = vector.broadcast %14 : vector<1x512xf32> to vector<5x512xf32>
    %16 = arith.mulf %13, %15 : vector<5x512xf32>
    %c1 = arith.constant 1 : index
    %c0_9 = arith.constant 0 : index
    %c0_10 = arith.constant 0 : index
    %17 = vector.load %arg2[%c1, %c0_9, %c0_10] : memref<9x32x5xf32, #tpu.memory_space<vmem>>, vector<1x32x5xf32>
    %18 = vector.shape_cast %17 : vector<1x32x5xf32> to vector<32x5xf32>
    %cst_11 = arith.constant dense<0.000000e+00> : vector<32x512xf32>
    %19 = tpu.matmul %18, %16, %cst_11 {dimension_numbers = #tpu.dot_dimension_numbers<[1], [0], [0], [1], [0, 0, 1, 1], [], []>} : vector<32x5xf32>, vector<5x512xf32>, vector<32x512xf32> -> vector<32x512xf32>
    %20 = arith.addf %12, %19 : vector<32x512xf32>
    %c15_i32 = arith.constant 15 : i32
    %21 = tpu.dynamic_rotate %0 by %c15_i32 dim 1 : vector<5x512xf32>, i32 -> vector<5x512xf32>
    %22 = vector.extract_strided_slice %1 {offsets = [2, 0], sizes = [1, 512], strides = [1, 1]} : vector<9x512xf32> to vector<1x512xf32>
    %23 = vector.broadcast %22 : vector<1x512xf32> to vector<5x512xf32>
    %24 = arith.mulf %21, %23 : vector<5x512xf32>
    %c2 = arith.constant 2 : index
    %c0_12 = arith.constant 0 : index
    %c0_13 = arith.constant 0 : index
    %25 = vector.load %arg2[%c2, %c0_12, %c0_13] : memref<9x32x5xf32, #tpu.memory_space<vmem>>, vector<1x32x5xf32>
    %26 = vector.shape_cast %25 : vector<1x32x5xf32> to vector<32x5xf32>
    %cst_14 = arith.constant dense<0.000000e+00> : vector<32x512xf32>
    %27 = tpu.matmul %26, %24, %cst_14 {dimension_numbers = #tpu.dot_dimension_numbers<[1], [0], [0], [1], [0, 0, 1, 1], [], []>} : vector<32x5xf32>, vector<5x512xf32>, vector<32x512xf32> -> vector<32x512xf32>
    %28 = arith.addf %20, %27 : vector<32x512xf32>
    %c1_i32 = arith.constant 1 : i32
    %29 = tpu.dynamic_rotate %0 by %c1_i32 dim 1 : vector<5x512xf32>, i32 -> vector<5x512xf32>
    %30 = vector.extract_strided_slice %1 {offsets = [3, 0], sizes = [1, 512], strides = [1, 1]} : vector<9x512xf32> to vector<1x512xf32>
    %31 = vector.broadcast %30 : vector<1x512xf32> to vector<5x512xf32>
    %32 = arith.mulf %29, %31 : vector<5x512xf32>
    %c3 = arith.constant 3 : index
    %c0_15 = arith.constant 0 : index
    %c0_16 = arith.constant 0 : index
    %33 = vector.load %arg2[%c3, %c0_15, %c0_16] : memref<9x32x5xf32, #tpu.memory_space<vmem>>, vector<1x32x5xf32>
    %34 = vector.shape_cast %33 : vector<1x32x5xf32> to vector<32x5xf32>
    %cst_17 = arith.constant dense<0.000000e+00> : vector<32x512xf32>
    %35 = tpu.matmul %34, %32, %cst_17 {dimension_numbers = #tpu.dot_dimension_numbers<[1], [0], [0], [1], [0, 0, 1, 1], [], []>} : vector<32x5xf32>, vector<5x512xf32>, vector<32x512xf32> -> vector<32x512xf32>
    %36 = arith.addf %28, %35 : vector<32x512xf32>
    %c511_i32 = arith.constant 511 : i32
    %37 = tpu.dynamic_rotate %0 by %c511_i32 dim 1 : vector<5x512xf32>, i32 -> vector<5x512xf32>
    %38 = vector.extract_strided_slice %1 {offsets = [5, 0], sizes = [1, 512], strides = [1, 1]} : vector<9x512xf32> to vector<1x512xf32>
    %39 = vector.broadcast %38 : vector<1x512xf32> to vector<5x512xf32>
    %40 = arith.mulf %37, %39 : vector<5x512xf32>
    %c5 = arith.constant 5 : index
    %c0_18 = arith.constant 0 : index
    %c0_19 = arith.constant 0 : index
    %41 = vector.load %arg2[%c5, %c0_18, %c0_19] : memref<9x32x5xf32, #tpu.memory_space<vmem>>, vector<1x32x5xf32>
    %42 = vector.shape_cast %41 : vector<1x32x5xf32> to vector<32x5xf32>
    %cst_20 = arith.constant dense<0.000000e+00> : vector<32x512xf32>
    %43 = tpu.matmul %42, %40, %cst_20 {dimension_numbers = #tpu.dot_dimension_numbers<[1], [0], [0], [1], [0, 0, 1, 1], [], []>} : vector<32x5xf32>, vector<5x512xf32>, vector<32x512xf32> -> vector<32x512xf32>
    %44 = arith.addf %36, %43 : vector<32x512xf32>
    %c497_i32 = arith.constant 497 : i32
    %45 = tpu.dynamic_rotate %0 by %c497_i32 dim 1 : vector<5x512xf32>, i32 -> vector<5x512xf32>
    %46 = vector.extract_strided_slice %1 {offsets = [6, 0], sizes = [1, 512], strides = [1, 1]} : vector<9x512xf32> to vector<1x512xf32>
    %47 = vector.broadcast %46 : vector<1x512xf32> to vector<5x512xf32>
    %48 = arith.mulf %45, %47 : vector<5x512xf32>
    %c6 = arith.constant 6 : index
    %c0_21 = arith.constant 0 : index
    %c0_22 = arith.constant 0 : index
    %49 = vector.load %arg2[%c6, %c0_21, %c0_22] : memref<9x32x5xf32, #tpu.memory_space<vmem>>, vector<1x32x5xf32>
    %50 = vector.shape_cast %49 : vector<1x32x5xf32> to vector<32x5xf32>
    %cst_23 = arith.constant dense<0.000000e+00> : vector<32x512xf32>
    %51 = tpu.matmul %50, %48, %cst_23 {dimension_numbers = #tpu.dot_dimension_numbers<[1], [0], [0], [1], [0, 0, 1, 1], [], []>} : vector<32x5xf32>, vector<5x512xf32>, vector<32x512xf32> -> vector<32x512xf32>
    %52 = arith.addf %44, %51 : vector<32x512xf32>
    %c496_i32 = arith.constant 496 : i32
    %53 = tpu.dynamic_rotate %0 by %c496_i32 dim 1 : vector<5x512xf32>, i32 -> vector<5x512xf32>
    %54 = vector.extract_strided_slice %1 {offsets = [7, 0], sizes = [1, 512], strides = [1, 1]} : vector<9x512xf32> to vector<1x512xf32>
    %55 = vector.broadcast %54 : vector<1x512xf32> to vector<5x512xf32>
    %56 = arith.mulf %53, %55 : vector<5x512xf32>
    %c7 = arith.constant 7 : index
    %c0_24 = arith.constant 0 : index
    %c0_25 = arith.constant 0 : index
    %57 = vector.load %arg2[%c7, %c0_24, %c0_25] : memref<9x32x5xf32, #tpu.memory_space<vmem>>, vector<1x32x5xf32>
    %58 = vector.shape_cast %57 : vector<1x32x5xf32> to vector<32x5xf32>
    %cst_26 = arith.constant dense<0.000000e+00> : vector<32x512xf32>
    %59 = tpu.matmul %58, %56, %cst_26 {dimension_numbers = #tpu.dot_dimension_numbers<[1], [0], [0], [1], [0, 0, 1, 1], [], []>} : vector<32x5xf32>, vector<5x512xf32>, vector<32x512xf32> -> vector<32x512xf32>
    %60 = arith.addf %52, %59 : vector<32x512xf32>
    %c495_i32 = arith.constant 495 : i32
    %61 = tpu.dynamic_rotate %0 by %c495_i32 dim 1 : vector<5x512xf32>, i32 -> vector<5x512xf32>
    %62 = vector.extract_strided_slice %1 {offsets = [8, 0], sizes = [1, 512], strides = [1, 1]} : vector<9x512xf32> to vector<1x512xf32>
    %63 = vector.broadcast %62 : vector<1x512xf32> to vector<5x512xf32>
    %64 = arith.mulf %61, %63 : vector<5x512xf32>
    %c8 = arith.constant 8 : index
    %c0_27 = arith.constant 0 : index
    %c0_28 = arith.constant 0 : index
    %65 = vector.load %arg2[%c8, %c0_27, %c0_28] : memref<9x32x5xf32, #tpu.memory_space<vmem>>, vector<1x32x5xf32>
    %66 = vector.shape_cast %65 : vector<1x32x5xf32> to vector<32x5xf32>
    %cst_29 = arith.constant dense<0.000000e+00> : vector<32x512xf32>
    %67 = tpu.matmul %66, %64, %cst_29 {dimension_numbers = #tpu.dot_dimension_numbers<[1], [0], [0], [1], [0, 0, 1, 1], [], []>} : vector<32x5xf32>, vector<5x512xf32>, vector<32x512xf32> -> vector<32x512xf32>
    %68 = arith.addf %60, %67 : vector<32x512xf32>
    %cst_30 = arith.constant 0.000000e+00 : f32
    %69 = vector.broadcast %cst_30 : f32 to vector<32x512xf32>
    %70 = arith.maximumf %68, %69 : vector<32x512xf32>
    %c0_31 = arith.constant 0 : index
    %c0_32 = arith.constant 0 : index
    %71 = vector.load %arg4[%c0_31, %c0_32] : memref<8x512xf32, #tpu.memory_space<vmem>>, vector<8x512xf32>
    %c4_33 = arith.constant 4 : index
    %c0_34 = arith.constant 0 : index
    %c0_35 = arith.constant 0 : index
    %72 = vector.load %arg3[%c4_33, %c0_34, %c0_35] : memref<9x8x32xf32, #tpu.memory_space<vmem>>, vector<1x8x32xf32>
    %73 = vector.shape_cast %72 : vector<1x8x32xf32> to vector<8x32xf32>
    %cst_36 = arith.constant dense<0.000000e+00> : vector<8x512xf32>
    %74 = tpu.matmul %73, %70, %cst_36 {dimension_numbers = #tpu.dot_dimension_numbers<[1], [0], [0], [1], [0, 0, 1, 1], [], []>} : vector<8x32xf32>, vector<32x512xf32>, vector<8x512xf32> -> vector<8x512xf32>
    %75 = arith.addf %71, %74 : vector<8x512xf32>
    %c0_37 = arith.constant 0 : index
    %c0_38 = arith.constant 0 : index
    %c0_39 = arith.constant 0 : index
    %76 = vector.load %arg3[%c0_37, %c0_38, %c0_39] : memref<9x8x32xf32, #tpu.memory_space<vmem>>, vector<1x8x32xf32>
    %77 = vector.shape_cast %76 : vector<1x8x32xf32> to vector<8x32xf32>
    %c17_i32_40 = arith.constant 17 : i32
    %78 = tpu.dynamic_rotate %70 by %c17_i32_40 dim 1 : vector<32x512xf32>, i32 -> vector<32x512xf32>
    %cst_41 = arith.constant dense<0.000000e+00> : vector<8x512xf32>
    %79 = tpu.matmul %77, %78, %cst_41 {dimension_numbers = #tpu.dot_dimension_numbers<[1], [0], [0], [1], [0, 0, 1, 1], [], []>} : vector<8x32xf32>, vector<32x512xf32>, vector<8x512xf32> -> vector<8x512xf32>
    %80 = vector.extract_strided_slice %1 {offsets = [0, 0], sizes = [1, 512], strides = [1, 1]} : vector<9x512xf32> to vector<1x512xf32>
    %81 = vector.broadcast %80 : vector<1x512xf32> to vector<8x512xf32>
    %82 = arith.mulf %79, %81 : vector<8x512xf32>
    %83 = arith.addf %75, %82 : vector<8x512xf32>
    %c1_42 = arith.constant 1 : index
    %c0_43 = arith.constant 0 : index
    %c0_44 = arith.constant 0 : index
    %84 = vector.load %arg3[%c1_42, %c0_43, %c0_44] : memref<9x8x32xf32, #tpu.memory_space<vmem>>, vector<1x8x32xf32>
    %85 = vector.shape_cast %84 : vector<1x8x32xf32> to vector<8x32xf32>
    %c16_i32_45 = arith.constant 16 : i32
    %86 = tpu.dynamic_rotate %70 by %c16_i32_45 dim 1 : vector<32x512xf32>, i32 -> vector<32x512xf32>
    %cst_46 = arith.constant dense<0.000000e+00> : vector<8x512xf32>
    %87 = tpu.matmul %85, %86, %cst_46 {dimension_numbers = #tpu.dot_dimension_numbers<[1], [0], [0], [1], [0, 0, 1, 1], [], []>} : vector<8x32xf32>, vector<32x512xf32>, vector<8x512xf32> -> vector<8x512xf32>
    %88 = vector.extract_strided_slice %1 {offsets = [1, 0], sizes = [1, 512], strides = [1, 1]} : vector<9x512xf32> to vector<1x512xf32>
    %89 = vector.broadcast %88 : vector<1x512xf32> to vector<8x512xf32>
    %90 = arith.mulf %87, %89 : vector<8x512xf32>
    %91 = arith.addf %83, %90 : vector<8x512xf32>
    %c2_47 = arith.constant 2 : index
    %c0_48 = arith.constant 0 : index
    %c0_49 = arith.constant 0 : index
    %92 = vector.load %arg3[%c2_47, %c0_48, %c0_49] : memref<9x8x32xf32, #tpu.memory_space<vmem>>, vector<1x8x32xf32>
    %93 = vector.shape_cast %92 : vector<1x8x32xf32> to vector<8x32xf32>
    %c15_i32_50 = arith.constant 15 : i32
    %94 = tpu.dynamic_rotate %70 by %c15_i32_50 dim 1 : vector<32x512xf32>, i32 -> vector<32x512xf32>
    %cst_51 = arith.constant dense<0.000000e+00> : vector<8x512xf32>
    %95 = tpu.matmul %93, %94, %cst_51 {dimension_numbers = #tpu.dot_dimension_numbers<[1], [0], [0], [1], [0, 0, 1, 1], [], []>} : vector<8x32xf32>, vector<32x512xf32>, vector<8x512xf32> -> vector<8x512xf32>
    %96 = vector.extract_strided_slice %1 {offsets = [2, 0], sizes = [1, 512], strides = [1, 1]} : vector<9x512xf32> to vector<1x512xf32>
    %97 = vector.broadcast %96 : vector<1x512xf32> to vector<8x512xf32>
    %98 = arith.mulf %95, %97 : vector<8x512xf32>
    %99 = arith.addf %91, %98 : vector<8x512xf32>
    %c3_52 = arith.constant 3 : index
    %c0_53 = arith.constant 0 : index
    %c0_54 = arith.constant 0 : index
    %100 = vector.load %arg3[%c3_52, %c0_53, %c0_54] : memref<9x8x32xf32, #tpu.memory_space<vmem>>, vector<1x8x32xf32>
    %101 = vector.shape_cast %100 : vector<1x8x32xf32> to vector<8x32xf32>
    %c1_i32_55 = arith.constant 1 : i32
    %102 = tpu.dynamic_rotate %70 by %c1_i32_55 dim 1 : vector<32x512xf32>, i32 -> vector<32x512xf32>
    %cst_56 = arith.constant dense<0.000000e+00> : vector<8x512xf32>
    %103 = tpu.matmul %101, %102, %cst_56 {dimension_numbers = #tpu.dot_dimension_numbers<[1], [0], [0], [1], [0, 0, 1, 1], [], []>} : vector<8x32xf32>, vector<32x512xf32>, vector<8x512xf32> -> vector<8x512xf32>
    %104 = vector.extract_strided_slice %1 {offsets = [3, 0], sizes = [1, 512], strides = [1, 1]} : vector<9x512xf32> to vector<1x512xf32>
    %105 = vector.broadcast %104 : vector<1x512xf32> to vector<8x512xf32>
    %106 = arith.mulf %103, %105 : vector<8x512xf32>
    %107 = arith.addf %99, %106 : vector<8x512xf32>
    %c5_57 = arith.constant 5 : index
    %c0_58 = arith.constant 0 : index
    %c0_59 = arith.constant 0 : index
    %108 = vector.load %arg3[%c5_57, %c0_58, %c0_59] : memref<9x8x32xf32, #tpu.memory_space<vmem>>, vector<1x8x32xf32>
    %109 = vector.shape_cast %108 : vector<1x8x32xf32> to vector<8x32xf32>
    %c511_i32_60 = arith.constant 511 : i32
    %110 = tpu.dynamic_rotate %70 by %c511_i32_60 dim 1 : vector<32x512xf32>, i32 -> vector<32x512xf32>
    %cst_61 = arith.constant dense<0.000000e+00> : vector<8x512xf32>
    %111 = tpu.matmul %109, %110, %cst_61 {dimension_numbers = #tpu.dot_dimension_numbers<[1], [0], [0], [1], [0, 0, 1, 1], [], []>} : vector<8x32xf32>, vector<32x512xf32>, vector<8x512xf32> -> vector<8x512xf32>
    %112 = vector.extract_strided_slice %1 {offsets = [5, 0], sizes = [1, 512], strides = [1, 1]} : vector<9x512xf32> to vector<1x512xf32>
    %113 = vector.broadcast %112 : vector<1x512xf32> to vector<8x512xf32>
    %114 = arith.mulf %111, %113 : vector<8x512xf32>
    %115 = arith.addf %107, %114 : vector<8x512xf32>
    %c6_62 = arith.constant 6 : index
    %c0_63 = arith.constant 0 : index
    %c0_64 = arith.constant 0 : index
    %116 = vector.load %arg3[%c6_62, %c0_63, %c0_64] : memref<9x8x32xf32, #tpu.memory_space<vmem>>, vector<1x8x32xf32>
    %117 = vector.shape_cast %116 : vector<1x8x32xf32> to vector<8x32xf32>
    %c497_i32_65 = arith.constant 497 : i32
    %118 = tpu.dynamic_rotate %70 by %c497_i32_65 dim 1 : vector<32x512xf32>, i32 -> vector<32x512xf32>
    %cst_66 = arith.constant dense<0.000000e+00> : vector<8x512xf32>
    %119 = tpu.matmul %117, %118, %cst_66 {dimension_numbers = #tpu.dot_dimension_numbers<[1], [0], [0], [1], [0, 0, 1, 1], [], []>} : vector<8x32xf32>, vector<32x512xf32>, vector<8x512xf32> -> vector<8x512xf32>
    %120 = vector.extract_strided_slice %1 {offsets = [6, 0], sizes = [1, 512], strides = [1, 1]} : vector<9x512xf32> to vector<1x512xf32>
    %121 = vector.broadcast %120 : vector<1x512xf32> to vector<8x512xf32>
    %122 = arith.mulf %119, %121 : vector<8x512xf32>
    %123 = arith.addf %115, %122 : vector<8x512xf32>
    %c7_67 = arith.constant 7 : index
    %c0_68 = arith.constant 0 : index
    %c0_69 = arith.constant 0 : index
    %124 = vector.load %arg3[%c7_67, %c0_68, %c0_69] : memref<9x8x32xf32, #tpu.memory_space<vmem>>, vector<1x8x32xf32>
    %125 = vector.shape_cast %124 : vector<1x8x32xf32> to vector<8x32xf32>
    %c496_i32_70 = arith.constant 496 : i32
    %126 = tpu.dynamic_rotate %70 by %c496_i32_70 dim 1 : vector<32x512xf32>, i32 -> vector<32x512xf32>
    %cst_71 = arith.constant dense<0.000000e+00> : vector<8x512xf32>
    %127 = tpu.matmul %125, %126, %cst_71 {dimension_numbers = #tpu.dot_dimension_numbers<[1], [0], [0], [1], [0, 0, 1, 1], [], []>} : vector<8x32xf32>, vector<32x512xf32>, vector<8x512xf32> -> vector<8x512xf32>
    %128 = vector.extract_strided_slice %1 {offsets = [7, 0], sizes = [1, 512], strides = [1, 1]} : vector<9x512xf32> to vector<1x512xf32>
    %129 = vector.broadcast %128 : vector<1x512xf32> to vector<8x512xf32>
    %130 = arith.mulf %127, %129 : vector<8x512xf32>
    %131 = arith.addf %123, %130 : vector<8x512xf32>
    %c8_72 = arith.constant 8 : index
    %c0_73 = arith.constant 0 : index
    %c0_74 = arith.constant 0 : index
    %132 = vector.load %arg3[%c8_72, %c0_73, %c0_74] : memref<9x8x32xf32, #tpu.memory_space<vmem>>, vector<1x8x32xf32>
    %133 = vector.shape_cast %132 : vector<1x8x32xf32> to vector<8x32xf32>
    %c495_i32_75 = arith.constant 495 : i32
    %134 = tpu.dynamic_rotate %70 by %c495_i32_75 dim 1 : vector<32x512xf32>, i32 -> vector<32x512xf32>
    %cst_76 = arith.constant dense<0.000000e+00> : vector<8x512xf32>
    %135 = tpu.matmul %133, %134, %cst_76 {dimension_numbers = #tpu.dot_dimension_numbers<[1], [0], [0], [1], [0, 0, 1, 1], [], []>} : vector<8x32xf32>, vector<32x512xf32>, vector<8x512xf32> -> vector<8x512xf32>
    %136 = vector.extract_strided_slice %1 {offsets = [8, 0], sizes = [1, 512], strides = [1, 1]} : vector<9x512xf32> to vector<1x512xf32>
    %137 = vector.broadcast %136 : vector<1x512xf32> to vector<8x512xf32>
    %138 = arith.mulf %135, %137 : vector<8x512xf32>
    %139 = arith.addf %131, %138 : vector<8x512xf32>
    %140 = vector.extract_strided_slice %139 {offsets = [0, 0], sizes = [1, 512], strides = [1, 1]} : vector<8x512xf32> to vector<1x512xf32>
    %141 = vector.extract_strided_slice %139 {offsets = [1, 0], sizes = [1, 512], strides = [1, 1]} : vector<8x512xf32> to vector<1x512xf32>
    %142 = vector.extract_strided_slice %139 {offsets = [0, 0], sizes = [2, 512], strides = [1, 1]} : vector<8x512xf32> to vector<2x512xf32>
    %143 = arith.maximumf %140, %141 : vector<1x512xf32>
    %144 = vector.broadcast %143 : vector<1x512xf32> to vector<2x512xf32>
    %145 = arith.subf %142, %144 : vector<2x512xf32>
    %146 = math.exp %145 : vector<2x512xf32>
    %147 = vector.extract_strided_slice %146 {offsets = [0, 0], sizes = [1, 512], strides = [1, 1]} : vector<2x512xf32> to vector<1x512xf32>
    %148 = vector.extract_strided_slice %146 {offsets = [1, 0], sizes = [1, 512], strides = [1, 1]} : vector<2x512xf32> to vector<1x512xf32>
    %149 = arith.addf %147, %148 : vector<1x512xf32>
    %150 = tpu.reciprocal %149 : vector<1x512xf32> -> vector<1x512xf32>
    %151 = vector.broadcast %150 : vector<1x512xf32> to vector<2x512xf32>
    %152 = arith.mulf %146, %151 : vector<2x512xf32>
    %153 = vector.extract_strided_slice %152 {offsets = [0, 0], sizes = [2, 256], strides = [1, 1]} : vector<2x512xf32> to vector<2x256xf32>
    %c0_77 = arith.constant 0 : index
    %c0_78 = arith.constant 0 : index
    %c0_79 = arith.constant 0 : index
    %154 = vector.load %arg6[%c0_77, %c0_78, %c0_79] : memref<2x8x256xf32, #tpu.memory_space<vmem>>, vector<1x2x256xf32>
    %155 = vector.shape_cast %154 : vector<1x2x256xf32> to vector<2x256xf32>
    %156 = vector.shape_cast %153 : vector<2x256xf32> to vector<1x2x256xf32>
    tpu.vector_store %arg6[%c0_77, %c0_78, %c0_79], %156 {strides = array<i32>} : memref<2x8x256xf32, #tpu.memory_space<vmem>>, vector<1x2x256xf32>,
    %157 = vector.extract_strided_slice %139 {offsets = [2, 0], sizes = [6, 256], strides = [1, 1]} : vector<8x512xf32> to vector<6x256xf32>
    %c0_80 = arith.constant 0 : index
    %c2_81 = arith.constant 2 : index
    %c0_82 = arith.constant 0 : index
    %158 = vector.load %arg6[%c0_80, %c2_81, %c0_82] : memref<2x8x256xf32, #tpu.memory_space<vmem>>, vector<1x6x256xf32>
    %159 = vector.shape_cast %158 : vector<1x6x256xf32> to vector<6x256xf32>
    %160 = vector.shape_cast %157 : vector<6x256xf32> to vector<1x6x256xf32>
    tpu.vector_store %arg6[%c0_80, %c2_81, %c0_82], %160 {strides = array<i32>} : memref<2x8x256xf32, #tpu.memory_space<vmem>>, vector<1x6x256xf32>,
    %161 = vector.extract_strided_slice %152 {offsets = [0, 256], sizes = [2, 256], strides = [1, 1]} : vector<2x512xf32> to vector<2x256xf32>
    %c1_83 = arith.constant 1 : index
    %c0_84 = arith.constant 0 : index
    %c0_85 = arith.constant 0 : index
    %162 = vector.load %arg6[%c1_83, %c0_84, %c0_85] : memref<2x8x256xf32, #tpu.memory_space<vmem>>, vector<1x2x256xf32>
    %163 = vector.shape_cast %162 : vector<1x2x256xf32> to vector<2x256xf32>
    %164 = vector.shape_cast %161 : vector<2x256xf32> to vector<1x2x256xf32>
    tpu.vector_store %arg6[%c1_83, %c0_84, %c0_85], %164 {strides = array<i32>} : memref<2x8x256xf32, #tpu.memory_space<vmem>>, vector<1x2x256xf32>,
    %165 = vector.extract_strided_slice %139 {offsets = [2, 256], sizes = [6, 256], strides = [1, 1]} : vector<8x512xf32> to vector<6x256xf32>
    %c1_86 = arith.constant 1 : index
    %c2_87 = arith.constant 2 : index
    %c0_88 = arith.constant 0 : index
    %166 = vector.load %arg6[%c1_86, %c2_87, %c0_88] : memref<2x8x256xf32, #tpu.memory_space<vmem>>, vector<1x6x256xf32>
    %167 = vector.shape_cast %166 : vector<1x6x256xf32> to vector<6x256xf32>
    %168 = vector.shape_cast %165 : vector<6x256xf32> to vector<1x6x256xf32>
    tpu.vector_store %arg6[%c1_86, %c2_87, %c0_88], %168 {strides = array<i32>} : memref<2x8x256xf32, #tpu.memory_space<vmem>>, vector<1x6x256xf32>,
    return
  }
  func.func @transform_0(%arg0: i32) -> (i32, i32) {
    %c0_i32 = arith.constant 0 : i32
    %c0_i32_0 = arith.constant 0 : i32
    %c0_i32_1 = arith.constant 0 : i32
    return %c0_i32, %c0_i32_0 : i32, i32
  }
  func.func @transform_1(%arg0: i32) -> (i32, i32, i32) {
    %c0_i32 = arith.constant 0 : i32
    %c0_i32_0 = arith.constant 0 : i32
    %c0_i32_1 = arith.constant 0 : i32
    %c0_i32_2 = arith.constant 0 : i32
    return %c0_i32, %c0_i32_0, %c0_i32_1 : i32, i32, i32
  }
  func.func @transform_2(%arg0: i32) -> (i32, i32, i32) {
    %c0_i32 = arith.constant 0 : i32
    %c0_i32_0 = arith.constant 0 : i32
    %c0_i32_1 = arith.constant 0 : i32
    %c0_i32_2 = arith.constant 0 : i32
    return %c0_i32, %c0_i32_0, %c0_i32_1 : i32, i32, i32
  }
  func.func @transform_3(%arg0: i32) -> (i32, i32) {
    %c0_i32 = arith.constant 0 : i32
    %c0_i32_0 = arith.constant 0 : i32
    %c0_i32_1 = arith.constant 0 : i32
    return %c0_i32, %c0_i32_0 : i32, i32
  }
  func.func @transform_4(%arg0: i32) -> (i32, i32) {
    %c0_i32 = arith.constant 0 : i32
    %c0_i32_0 = arith.constant 0 : i32
    %c0_i32_1 = arith.constant 0 : i32
    return %c0_i32, %c0_i32_0 : i32, i32
  }
  func.func @transform_5(%arg0: i32) -> (i32, i32, i32) {
    %c0_i32 = arith.constant 0 : i32
    %c0_i32_0 = arith.constant 0 : i32
    %c0_i32_1 = arith.constant 0 : i32
    %c0_i32_2 = arith.constant 0 : i32
    return %c0_i32, %c0_i32_0, %c0_i32_1 : i32, i32, i32
  }
}

</mosaic_0001>

<bundles_post_ra>
// kernel: mapnet_forward.1
= control target key start
LH: loop header
LB: loop body
LE: loop exit
PB: predicated region body
PF: predicated region fallthrough
CT: control target
= control target key end

     0   :  { %v6214_v2 = vmov 0.0   ;;  %s4370_s22 = smov 17   ;;  %s4371_s27 = smov 16   ;;  %v45_v5 = vlaneseq  ;;  %vm89_vm1 = vcmask 1044480   ;;  %vm76_vm3 = vcmask 39936   ;;  %s6208_s0 = inlined_call_operand.vmem [shape: f32[5,512], index: 0, kind: input, shape index: {}]   ;;  %s6209_s4 = inlined_call_operand.vmem [shape: f32[9,512], index: 4, kind: input, shape index: {}]   ;;  %s6210_s1 = inlined_call_operand.vmem [shape: f32[9,32,5], index: 1, kind: input, shape index: {}]   ;;  %s6211_s2 = inlined_call_operand.vmem [shape: f32[9,8,32], index: 2, kind: input, shape index: {}]   ;;  %s6212_s3 = inlined_call_operand.vmem [shape: f32[8,512], index: 3, kind: input, shape index: {}]   ;;  %s6213_s5 = inlined_call_operand.vmem [shape: f32[2,8,256], index: 5, kind: output, shape index: {}]  }
   0x1   :  { %v4411_v0 = vld [vmem:[%s6208_s0 + $0x10] sm:$0x1f]  ;;  %v4416_v1 = vld [vmem:[%s6208_s0] sm:$0x1f]  ;;  %166 = vmatprep.mubr.f32.mxu0 %v6214_v2  ;;  %255 = vmatprep.mubr.f32.mxu1 %v6214_v2  ;;  %v4427_v3 = vld [vmem:[%s6208_s0 + $0x18] sm:$0x1f] }
   0x2   :  { %41 = vrot.lane.b32.xlu1 %v4411_v0, %s4370_s22  ;;  %37 = vrot.lane.b32.xlu0 %v4416_v1, %s4370_s22  ;;  %v4432_v4 = vld [vmem:[%s6208_s0 + $0x8] sm:$0x1f]  ;;  %s4372_s0 = smov 15   ;;  %s4373_s28 = smov 1   ;;  %v4494_v6 = vshrl.u32 %v45_v5, 7  ;;  %v4496_v7 = vand.u32 127, %v45_v5 }
   0x3   :  { %s4374_s29 = smov 127   ;;  %s4375_s30 = smov 113   ;;  %v4501_v8 = vld [vmem:[%s6209_s4 + $0x8] sm:$0xff]  ;;  %v4509_v10 = vld [vmem:[%s6209_s4 + $0x18] sm:$0xff]  ;;  %v4514_v11 = vld [vmem:[%s6209_s4] sm:$0xff]  ;;  %vm2296_vm10 = vcmask 261120  }
   0x4   :  { %s4376_s6 = smov 112   ;;  %s4377_s7 = smov 111   ;;  %6260 = vst [vmem:[#allocation2_spill] sm:$0xff] %v4496_v7  ;;  %v4504_v9 = vsub.s32 0, %v4494_v6  ;;  %v4519_v12 = vld [vmem:[%s6209_s4 + $0x10] sm:$0xff]  ;;  %v497_v15 = vsub.s32 1, %v4494_v6 }
   0x5   :  { %vm47_vm0 = vcmp.lt.s32.totalorder %v4496_v7, 17  ;;  %vm490_vm2 = vcmp.lt.s32.totalorder %v4496_v7, 16  ;;  %v72_v31 = vld [vmem:[%s6210_s1] sm:$0xff]  ;;  %v73_v37 = vld [vmem:[%s6210_s1 + $0x8] sm:$0xff]  ;;  %v74_v42 = vld [vmem:[%s6210_s1 + $0x10] sm:$0xff]  ;;  %v753_v45 = vsub.s32 2, %v4494_v6 }
   0x6   :  { %43 = vrot.lane.b32.xlu1 %v4427_v3, %s4370_s22  ;;  %39 = vrot.lane.b32.xlu0 %v4432_v4, %s4370_s22  ;;  %6261 = vst [vmem:[#allocation3_spill] sm:$0xff] %v4504_v9  ;;  %v4525_v16 = vrot.slane %v4501_v8, %v4504_v9  ;;  %v4529_v17 = vrot.slane %v4509_v10, %v4504_v9  ;;  %v75_v48 = vld [vmem:[%s6210_s1 + $0x18] sm:$0xff]  ;;  %vm746_vm4 = vcmp.lt.s32.totalorder %v4496_v7, 15  ;;  %v4166_v59 = vld [vmem:[%s6210_s1 + $0x80] sm:$0xff]  ;;  %vm1002_vm5 = vcmp.lt.s32.totalorder %v4496_v7, 1 }
   0x7   :  { %v4533_v18 = vrot.slane %v4514_v11, %v4504_v9  ;;  %v4537_v19 = vrot.slane %v4519_v12, %v4504_v9  ;;  %v4541_v22 = vrot.slane %v4501_v8, %v497_v15  ;;  %v4568_v36 = vrot.slane %v4509_v10, %v497_v15  ;;  %v4167_v62 = vld [vmem:[%s6210_s1 + $0x88] sm:$0xff] }
   0x8   :  { %6262 = vst [vmem:[#allocation4_spill] sm:$0xff] %v4525_v16  ;;  %6263 = vst [vmem:[#allocation5_spill] sm:$0xff] %v4529_v17  ;;  %v4599_v46 = vrot.slane %v4519_v12, %v497_v15  ;;  %v4602_v47 = vrot.slane %v4514_v11, %v497_v15  ;;  %v4615_v53 = vrot.slane %v4501_v8, %v753_v45  ;;  %vm1258_vm6 = vcmp.lt.s32.totalorder %v4496_v7, 127 }
   0x9   :  { %6264 = vst [vmem:[#allocation6_spill] sm:$0xff] %v4533_v18  ;;  %6265 = vst [vmem:[#allocation7_spill] sm:$0xff] %v4537_v19  ;;  %v4618_v54 = vrot.slane %v4509_v10, %v753_v45  ;;  %v4660_v5 = vrot.slane %v4514_v11, %v753_v45  ;;  %vm1514_vm7 = vcmp.lt.s32.totalorder %v4496_v7, 113  ;;  %vm1770_vm8 = vcmp.lt.s32.totalorder %v4496_v7, 112 }
   0xa   :  { %482 = vrot.lane.b32.xlu0 %v4416_v1, %s4371_s27  ;;  %484 = vrot.lane.b32.xlu1 %v4432_v4, %s4371_s27  ;;  %6266 = vst [vmem:[#allocation8_spill] sm:$0xff] %v4541_v22  ;;  %6267 = vst [vmem:[#allocation9_spill] sm:$0xff] %v4568_v36  ;;  %vm2026_vm9 = vcmp.lt.s32.totalorder %v4496_v7, 111 }
   0xb   :  { %6268 = vst [vmem:[#allocation10_spill] sm:$0xff] %v4599_v46  ;;  %6269 = vst [vmem:[#allocation11_spill] sm:$0xff] %v4602_v47 }
   0xc   :  { %6270 = vst [vmem:[#allocation12_spill] sm:$0xff] %v4615_v53  ;;  %6271 = vst [vmem:[#allocation13_spill] sm:$0xff] %v4618_v54 }
   0xd   :  { %6273 = vst [vmem:[#allocation15_spill] sm:$0xff] %v4660_v5 }
   0xe   :  { %486 = vrot.lane.b32.xlu0 %v4411_v0, %s4371_s27  ;;  %488 = vrot.lane.b32.xlu1 %v4427_v3, %s4371_s27 }
  0x12   :  { %738 = vrot.lane.b32.xlu0 %v4416_v1, %s4372_s0  ;;  %740 = vrot.lane.b32.xlu1 %v4432_v4, %s4372_s0 }
  0x16   :  { %742 = vrot.lane.b32.xlu0 %v4411_v0, %s4372_s0  ;;  %744 = vrot.lane.b32.xlu1 %v4427_v3, %s4372_s0 }
  0x1a   :  { %994 = vrot.lane.b32.xlu0 %v4416_v1, %s4373_s28  ;;  %996 = vrot.lane.b32.xlu1 %v4432_v4, %s4373_s28 }
  0x1e   :  { %998 = vrot.lane.b32.xlu0 %v4411_v0, %s4373_s28  ;;  %1000 = vrot.lane.b32.xlu1 %v4427_v3, %s4373_s28 }
  0x22   :  { %1252 = vrot.lane.b32.xlu1 %v4432_v4, %s4374_s29  ;;  %1250 = vrot.lane.b32.xlu0 %v4416_v1, %s4374_s29 }
  0x26   :  { %1256 = vrot.lane.b32.xlu1 %v4427_v3, %s4374_s29  ;;  %1254 = vrot.lane.b32.xlu0 %v4411_v0, %s4374_s29 }
  0x2a   :  { %1508 = vrot.lane.b32.xlu1 %v4432_v4, %s4375_s30  ;;  %1506 = vrot.lane.b32.xlu0 %v4416_v1, %s4375_s30 }
  0x2e   :  { %1512 = vrot.lane.b32.xlu1 %v4427_v3, %s4375_s30  ;;  %1510 = vrot.lane.b32.xlu0 %v4411_v0, %s4375_s30 }
  0x32   :  { %1764 = vrot.lane.b32.xlu1 %v4432_v4, %s4376_s6  ;;  %1762 = vrot.lane.b32.xlu0 %v4416_v1, %s4376_s6 }
  0x36   :  { %1768 = vrot.lane.b32.xlu1 %v4427_v3, %s4376_s6  ;;  %1766 = vrot.lane.b32.xlu0 %v4411_v0, %s4376_s6 }
  0x3a   :  { %2020 = vrot.lane.b32.xlu1 %v4432_v4, %s4377_s7  ;;  %2018 = vrot.lane.b32.xlu0 %v4416_v1, %s4377_s7 }
  0x3e   :  { %2024 = vrot.lane.b32.xlu1 %v4427_v3, %s4377_s7  ;;  %2022 = vrot.lane.b32.xlu0 %v4411_v0, %s4377_s7 }
  0x74   :  { %v42_v13 = vpop.permute.xlu1 %41  ;;  %v38_v14 = vpop.permute.xlu0 %37 }
  0x78   :  { %v44_v20 = vpop.permute.xlu1 %43  ;;  %v40_v21 = vpop.permute.xlu0 %39 }
  0x79   :  { %v51_v23 = vsel %vm47_vm0, %v44_v20, %v38_v14  ;;  %v49_v24 = vsel %vm47_vm0, %v40_v21, %v42_v13  ;;  %v50_v25 = vsel %vm47_vm0, %v38_v14, %v40_v21  ;;  %v48_v26 = vsel %vm47_vm0, %v42_v13, %v44_v20  ;;  %v4169_v13 = vld [vmem:[%s6210_s1 + $0x98] sm:$0xff] }
  0x7a   :  { %v69_v27 = vmul.f32 %v4525_v16, %v50_v25  ;;  %v71_v28 = vmul.f32 %v4529_v17, %v48_v26  ;;  %v68_v29 = vmul.f32 %v4533_v18, %v51_v23  ;;  %v70_v30 = vmul.f32 %v4537_v19, %v49_v24 }
  0x7c   :  { %4170 = vmatprep.subr.msk.mxu0 %vm89_vm1, %v69_v27  ;;  %4176 = vmatprep.subr.msk.mxu1 %vm89_vm1, %v71_v28  ;;  %v483_v32 = vpop.permute.xlu0 %482  ;;  %v485_v33 = vpop.permute.xlu1 %484 }
  0x7d   :  { %4171 = vmatpush1.msk.msra.mxu0 %vm89_vm1, %v68_v29  ;;  %4177 = vmatpush1.msk.msra.mxu1 %vm89_vm1, %v70_v30  ;;  %v493_v34 = vsel %vm490_vm2, %v483_v32, %v485_v33  ;;  %v4194_v29 = vld [vmem:[%s6210_s1 + $0x20] sm:$0xff] }
  0x7e   :  { %4172 = vmatmul.mubr.msk.f32.vlgmr.msra.gmra.mxu0 %vm76_vm3, %v72_v31  ;;  %4178 = vmatmul.mubr.msk.f32.vlgmr.msra.gmra.mxu1 %vm76_vm3, %v72_v31  ;;  %v512_v35 = vmul.f32 %v4541_v22, %v493_v34 }
  0x7f   :  { %4182 = vmatprep.subr.msk.mxu0 %vm89_vm1, %v4432_v4  ;;  %172 = vmatprep.mubr.f32.mxu0 %v6214_v2  ;;  %v4657_v4 = vrot.slane %v4519_v12, %v753_v45 }
  0x80   :  { %4183 = vmatpush1.msk.msra.mxu0 %vm89_vm1, %v4416_v1  ;;  %261 = vmatprep.mubr.f32.mxu1 %v6214_v2  ;;  %v487_v38 = vpop.permute.xlu0 %486  ;;  %v489_v39 = vpop.permute.xlu1 %488  ;;  %v4168_v1 = vld [vmem:[%s6210_s1 + $0x90] sm:$0xff] }
  0x81   :  { %4188 = vmatprep.subr.msk.mxu1 %vm89_vm1, %v4427_v3  ;;  %v491_v40 = vsel %vm490_vm2, %v487_v38, %v489_v39  ;;  %4198 = vmatprep.subr.msk.mxu0 %vm89_vm1, %v512_v35  ;;  %v492_v49 = vsel %vm490_vm2, %v485_v33, %v487_v38  ;;  %v494_v50 = vsel %vm490_vm2, %v489_v39, %v483_v32  ;;  %v1009_v3 = vsub.s32 3, %v4494_v6  ;;  %v4195_v32 = vld [vmem:[%s6210_s1 + $0x28] sm:$0xff]  ;;  %v4196_v35 = vld [vmem:[%s6210_s1 + $0x30] sm:$0xff] }
  0x82   :  { %4173 = vmatmul.mubr.msk.f32.gmra.mxu0 %vm76_vm3, %v73_v37  ;;  %4179 = vmatmul.mubr.msk.f32.gmra.mxu1 %vm76_vm3, %v73_v37  ;;  %v514_v41 = vmul.f32 %v4568_v36, %v491_v40  ;;  %v513_v57 = vmul.f32 %v4599_v46, %v492_v49  ;;  %v511_v58 = vmul.f32 %v4602_v47, %v494_v50  ;;  %v1265_v37 = vsub.s32 5, %v4494_v6  ;;  %v4197_v40 = vld [vmem:[%s6210_s1 + $0x38] sm:$0xff] }
  0x83   :  { %4189 = vmatpush1.msk.msra.mxu1 %vm89_vm1, %v4411_v0  ;;  %178 = vmatprep.mubr.f32.mxu0 %v6214_v2  ;;  %6272 = vst [vmem:[#allocation14_spill] sm:$0xff] %v4657_v4  ;;  %v4673_v23 = vrot.slane %v4501_v8, %v1009_v3  ;;  %v4676_v24 = vrot.slane %v4509_v10, %v1009_v3 }
  0x84   :  { %267 = vmatprep.mubr.f32.mxu1 %v6214_v2  ;;  %4204 = vmatprep.subr.msk.mxu1 %vm89_vm1, %v514_v41  ;;  %v739_v43 = vpop.permute.xlu0 %738  ;;  %v741_v44 = vpop.permute.xlu1 %740  ;;  %v4715_v38 = vrot.slane %v4519_v12, %v1009_v3  ;;  %v4718_v39 = vrot.slane %v4514_v11, %v1009_v3  ;;  %v4731_v45 = vrot.slane %v4509_v10, %v1265_v37 }
  0x85   :  { %v749_v55 = vsel %vm746_vm4, %v739_v43, %v741_v44  ;;  %6274 = vst [vmem:[#allocation16_spill] sm:$0xff] %v4673_v23  ;;  %6275 = vst [vmem:[#allocation17_spill] sm:$0xff] %v4676_v24 }
  0x86   :  { %4174 = vmatmul.mubr.msk.f32.gmra.mxu0 %vm76_vm3, %v74_v42  ;;  %4180 = vmatmul.mubr.msk.f32.gmra.mxu1 %vm76_vm3, %v74_v42  ;;  %v768_v60 = vmul.f32 %v4615_v53, %v749_v55  ;;  %6276 = vst [vmem:[#allocation18_spill] sm:$0xff] %v4715_v38  ;;  %6277 = vst [vmem:[#allocation19_spill] sm:$0xff] %v4718_v39  ;;  %v4210_v55 = vld [vmem:[%s6210_s1 + $0x40] sm:$0xff] }
  0x87   :  { %184 = vmatprep.mubr.f32.mxu0 %v6214_v2  ;;  %273 = vmatprep.mubr.f32.mxu1 %v6214_v2  ;;  %6278 = vst [vmem:[#allocation20_spill] sm:$0xff] %v4731_v45 }
  0x88   :  { %v743_v51 = vpop.permute.xlu0 %742  ;;  %v745_v52 = vpop.permute.xlu1 %744 }
  0x89   :  { %v747_v56 = vsel %vm746_vm4, %v743_v51, %v745_v52  ;;  %v748_v20 = vsel %vm746_vm4, %v741_v44, %v743_v51  ;;  %v750_v21 = vsel %vm746_vm4, %v745_v52, %v739_v43 }
  0x8a   :  { %4175 = vmatmul.mubr.msk.f32.gmra.mxu0 %vm76_vm3, %v75_v48  ;;  %4181 = vmatmul.mubr.msk.f32.gmra.mxu1 %vm76_vm3, %v75_v48  ;;  %v770_v61 = vmul.f32 %v4618_v54, %v747_v56  ;;  %v769_v27 = vmul.f32 %v4657_v4, %v748_v20  ;;  %v767_v28 = vmul.f32 %v4660_v5, %v750_v21 }
  0x8b   :  { %368 = vmatprep.mubr.f32.mxu0 %v6214_v2  ;;  %457 = vmatprep.mubr.f32.mxu1 %v6214_v2  ;;  %v4734_v48 = vrot.slane %v4501_v8, %v1265_v37 }
  0x8c   :  { %v995_v63 = vpop.permute.xlu0 %994  ;;  %v997_v0 = vpop.permute.xlu1 %996 }
  0x8d   :  { %v1005_v25 = vsel %vm1002_vm5, %v995_v63, %v997_v0  ;;  %6279 = vst [vmem:[#allocation21_spill] sm:$0xff] %v4734_v48 }
  0x8e   :  { %4184 = vmatmul.mubr.msk.f32.vlgmr.msra.gmra.mxu0 %vm76_vm3, %v4166_v59  ;;  %4190 = vmatmul.mubr.msk.f32.vlgmr.msra.gmra.mxu1 %vm76_vm3, %v4166_v59  ;;  %v1024_v30 = vmul.f32 %v4673_v23, %v1005_v25 }
  0x8f   :  { %4199 = vmatpush1.msk.msra.mxu0 %vm89_vm1, %v511_v58  ;;  %4205 = vmatpush1.msk.msra.mxu1 %vm89_vm1, %v513_v57  ;;  %v4211_v58 = vld [vmem:[%s6210_s1 + $0x48] sm:$0xff] }
  0x90   :  { %374 = vmatprep.mubr.f32.mxu0 %v6214_v2  ;;  %463 = vmatprep.mubr.f32.mxu1 %v6214_v2  ;;  %v999_v14 = vpop.permute.xlu0 %998  ;;  %v1001_v15 = vpop.permute.xlu1 %1000 }
  0x91   :  { %4214 = vmatprep.subr.msk.mxu0 %vm89_vm1, %v768_v60  ;;  %4220 = vmatprep.subr.msk.mxu1 %vm89_vm1, %v770_v61  ;;  %v1003_v26 = vsel %vm1002_vm5, %v999_v14, %v1001_v15  ;;  %v1004_v43 = vsel %vm1002_vm5, %v997_v0, %v999_v14  ;;  %v1006_v44 = vsel %vm1002_vm5, %v1001_v15, %v995_v63  ;;  %v4212_v61 = vld [vmem:[%s6210_s1 + $0x50] sm:$0xff] }
  0x92   :  { %4185 = vmatmul.mubr.msk.f32.gmra.mxu0 %vm76_vm3, %v4167_v62  ;;  %4191 = vmatmul.mubr.msk.f32.gmra.mxu1 %vm76_vm3, %v4167_v62  ;;  %v1026_v31 = vmul.f32 %v4676_v24, %v1003_v26  ;;  %v1025_v51 = vmul.f32 %v4715_v38, %v1004_v43  ;;  %v1023_v52 = vmul.f32 %v4718_v39, %v1006_v44  ;;  %v1521_v62 = vsub.s32 6, %v4494_v6 }
  0x93   :  { %380 = vmatprep.mubr.f32.mxu0 %v6214_v2  ;;  %469 = vmatprep.mubr.f32.mxu1 %v6214_v2  ;;  %v4773_v63 = vrot.slane %v4514_v11, %v1265_v37  ;;  %v4778_v0 = vrot.slane %v4519_v12, %v1265_v37  ;;  %v1777_v37 = vsub.s32 7, %v4494_v6 }
  0x94   :  { %v1253_v33 = vpop.permute.xlu1 %1252  ;;  %v1251_v34 = vpop.permute.xlu0 %1250  ;;  %v4789_v20 = vrot.slane %v4509_v10, %v1521_v62  ;;  %v4792_v21 = vrot.slane %v4501_v8, %v1521_v62 }
  0x95   :  { %6280 = vst [vmem:[#allocation22_spill] sm:$0xff] %v4773_v63  ;;  %6281 = vst [vmem:[#allocation23_spill] sm:$0xff] %v4778_v0  ;;  %v1261_v14 = vsel %vm1258_vm6, %v1251_v34, %v1253_v33 }
  0x96   :  { %4186 = vmatmul.mubr.msk.f32.gmra.mxu0 %vm76_vm3, %v4168_v1  ;;  %4192 = vmatmul.mubr.msk.f32.gmra.mxu1 %vm76_vm3, %v4168_v1  ;;  %v4213_v1 = vld [vmem:[%s6210_s1 + $0x58] sm:$0xff]  ;;  %6282 = vst [vmem:[#allocation24_spill] sm:$0xff] %v4789_v20  ;;  %6283 = vst [vmem:[#allocation25_spill] sm:$0xff] %v4792_v21 }
  0x97   :  { %386 = vmatprep.mubr.f32.mxu0 %v6214_v2  ;;  %475 = vmatprep.mubr.f32.mxu1 %v6214_v2 }
  0x98   :  { %v1257_v41 = vpop.permute.xlu1 %1256  ;;  %v1255_v42 = vpop.permute.xlu0 %1254 }
  0x99   :  { %v1262_v49 = vsel %vm1258_vm6, %v1257_v41, %v1251_v34  ;;  %v1260_v50 = vsel %vm1258_vm6, %v1253_v33, %v1255_v42  ;;  %v1259_v15 = vsel %vm1258_vm6, %v1255_v42, %v1257_v41  ;;  %v4836_v41 = vrot.slane %v4519_v12, %v1521_v62  ;;  %v4229_v42 = vld [vmem:[%s6210_s1 + $0x78] sm:$0xff] }
  0x9a   :  { %4187 = vmatmul.mubr.msk.f32.gmra.mxu0 %vm76_vm3, %v4169_v13  ;;  %4193 = vmatmul.mubr.msk.f32.gmra.mxu1 %vm76_vm3, %v4169_v13  ;;  %v1282_v56 = vmul.f32 %v4731_v45, %v1262_v49  ;;  %v1280_v57 = vmul.f32 %v4734_v48, %v1260_v50  ;;  %v4847_v50 = vrot.slane %v4509_v10, %v1777_v37 }
  0x9b   :  { %608 = vmatprep.mubr.f32.mxu0 %v6214_v2  ;;  %697 = vmatprep.mubr.f32.mxu1 %v6214_v2  ;;  %6285 = vst [vmem:[#allocation27_spill] sm:$0xff] %v4836_v41 }
  0x9c   :  { %v1509_v59 = vpop.permute.xlu1 %1508  ;;  %v1507_v60 = vpop.permute.xlu0 %1506  ;;  %6286 = vst [vmem:[#allocation28_spill] sm:$0xff] %v4847_v50 }
  0x9d   :  { %v1517_v44 = vsel %vm1514_vm7, %v1507_v60, %v1509_v59 }
  0x9e   :  { %4200 = vmatmul.mubr.msk.f32.vlgmr.msra.gmra.mxu0 %vm76_vm3, %v4194_v29  ;;  %4206 = vmatmul.mubr.msk.f32.vlgmr.msra.gmra.mxu1 %vm76_vm3, %v4194_v29  ;;  %v4226_v29 = vld [vmem:[%s6210_s1 + $0x60] sm:$0xff] }
  0x9f   :  { %4215 = vmatpush1.msk.msra.mxu0 %vm89_vm1, %v767_v28  ;;  %4221 = vmatpush1.msk.msra.mxu1 %vm89_vm1, %v769_v27  ;;  %v1279_v27 = vmul.f32 %v4773_v63, %v1261_v14  ;;  %v1281_v28 = vmul.f32 %v4778_v0, %v1259_v15 }
  0xa0   :  { %614 = vmatprep.mubr.f32.mxu0 %v6214_v2  ;;  %703 = vmatprep.mubr.f32.mxu1 %v6214_v2  ;;  %v1513_v3 = vpop.permute.xlu1 %1512  ;;  %v1511_v13 = vpop.permute.xlu0 %1510 }
  0xa1   :  { %4230 = vmatprep.subr.msk.mxu0 %vm89_vm1, %v1024_v30  ;;  %4236 = vmatprep.subr.msk.mxu1 %vm89_vm1, %v1026_v31  ;;  %v1518_v25 = vsel %vm1514_vm7, %v1513_v3, %v1507_v60  ;;  %v1516_v26 = vsel %vm1514_vm7, %v1509_v59, %v1511_v13  ;;  %v1515_v49 = vsel %vm1514_vm7, %v1511_v13, %v1513_v3  ;;  %v4243_v59 = vld [vmem:[%s6210_s1 + $0xa8] sm:$0xff]  ;;  %v4245_v13 = vld [vmem:[%s6210_s1 + $0xb8] sm:$0xff] }
  0xa2   :  { %4201 = vmatmul.mubr.msk.f32.gmra.mxu0 %vm76_vm3, %v4195_v32  ;;  %4207 = vmatmul.mubr.msk.f32.gmra.mxu1 %vm76_vm3, %v4195_v32  ;;  %v1538_v30 = vmul.f32 %v4789_v20, %v1518_v25  ;;  %v1536_v31 = vmul.f32 %v4792_v21, %v1516_v26  ;;  %v4227_v32 = vld [vmem:[%s6210_s1 + $0x68] sm:$0xff]  ;;  %v4893_v3 = vrot.slane %v4519_v12, %v1777_v37  ;;  %v4293_v12 = vld [vmem:[%s6209_s4 + $0x38] ss:$0 sm:$0xff] }
  0xa3   :  { %620 = vmatprep.mubr.f32.mxu0 %v6214_v2  ;;  %709 = vmatprep.mubr.f32.mxu1 %v6214_v2 }
  0xa4   :  { %v1765_v33 = vpop.permute.xlu1 %1764  ;;  %v1763_v34 = vpop.permute.xlu0 %1762  ;;  %6289 = vst [vmem:[#allocation31_spill] sm:$0xff] %v4893_v3 }
  0xa5   :  { %v1773_v25 = vsel %vm1770_vm8, %v1763_v34, %v1765_v33 }
  0xa6   :  { %4202 = vmatmul.mubr.msk.f32.gmra.mxu0 %vm76_vm3, %v4196_v35  ;;  %4208 = vmatmul.mubr.msk.f32.gmra.mxu1 %vm76_vm3, %v4196_v35  ;;  %v4228_v35 = vld [vmem:[%s6210_s1 + $0x70] sm:$0xff] }
  0xa7   :  { %626 = vmatprep.mubr.f32.mxu0 %v6214_v2  ;;  %715 = vmatprep.mubr.f32.mxu1 %v6214_v2 }
  0xa8   :  { %v1769_v6 = vpop.permute.xlu1 %1768  ;;  %v1767_v43 = vpop.permute.xlu0 %1766 }
  0xaa   :  { %4203 = vmatmul.mubr.msk.f32.gmra.mxu0 %vm76_vm3, %v4197_v40  ;;  %4209 = vmatmul.mubr.msk.f32.gmra.mxu1 %vm76_vm3, %v4197_v40  ;;  %v4831_v40 = vrot.slane %v4514_v11, %v1521_v62  ;;  %v4244_v62 = vld [vmem:[%s6210_s1 + $0xb0] sm:$0xff] }
  0xab   :  { %864 = vmatprep.mubr.f32.mxu0 %v6214_v2  ;;  %953 = vmatprep.mubr.f32.mxu1 %v6214_v2 }
  0xac   :  { %6284 = vst [vmem:[#allocation26_spill] sm:$0xff] %v4831_v40  ;;  %v2021_v60 = vpop.permute.xlu1 %2020 }
  0xae   :  { %4216 = vmatmul.mubr.msk.f32.vlgmr.msra.gmra.mxu0 %vm76_vm3, %v4210_v55  ;;  %4222 = vmatmul.mubr.msk.f32.vlgmr.msra.gmra.mxu1 %vm76_vm3, %v4210_v55  ;;  %v1772_v55 = vsel %vm1770_vm8, %v1765_v33, %v1767_v43 }
  0xaf   :  { %4231 = vmatpush1.msk.msra.mxu0 %vm89_vm1, %v1023_v52  ;;  %4237 = vmatpush1.msk.msra.mxu1 %vm89_vm1, %v1025_v51  ;;  %v4850_v51 = vrot.slane %v4501_v8, %v1777_v37  ;;  %v1774_v52 = vsel %vm1770_vm8, %v1769_v6, %v1763_v34  ;;  %v4242_v8 = vld [vmem:[%s6210_s1 + $0xa0] sm:$0xff]  ;;  %v4259_v34 = vld [vmem:[%s6210_s1 + $0xc8] sm:$0xff] }
  0xb0   :  { %870 = vmatprep.mubr.f32.mxu0 %v6214_v2  ;;  %959 = vmatprep.mubr.f32.mxu1 %v6214_v2  ;;  %v1794_v10 = vmul.f32 %v4847_v50, %v1774_v52  ;;  %v2025_v14 = vpop.permute.xlu1 %2024 }
  0xb1   :  { %4252 = vmatprep.subr.msk.mxu1 %vm89_vm1, %v1282_v56  ;;  %4246 = vmatprep.subr.msk.mxu0 %vm89_vm1, %v1280_v57  ;;  %6287 = vst [vmem:[#allocation29_spill] sm:$0xff] %v4850_v51  ;;  %v1535_v56 = vmul.f32 %v4831_v40, %v1517_v44  ;;  %v1537_v57 = vmul.f32 %v4836_v41, %v1515_v49 }
  0xb2   :  { %4217 = vmatmul.mubr.msk.f32.gmra.mxu0 %vm76_vm3, %v4211_v58  ;;  %4223 = vmatmul.mubr.msk.f32.gmra.mxu1 %vm76_vm3, %v4211_v58  ;;  %v1792_v58 = vmul.f32 %v4850_v51, %v1772_v55  ;;  %v4274_v55 = vld [vmem:[%s6210_s1 + $0xe0] sm:$0xff] }
  0xb3   :  { %876 = vmatprep.mubr.f32.mxu0 %v6214_v2  ;;  %965 = vmatprep.mubr.f32.mxu1 %v6214_v2 }
  0xb6   :  { %4218 = vmatmul.mubr.msk.f32.gmra.mxu0 %vm76_vm3, %v4212_v61  ;;  %4224 = vmatmul.mubr.msk.f32.gmra.mxu1 %vm76_vm3, %v4212_v61  ;;  %v2019_v61 = vpop.permute.xlu0 %2018 }
  0xb7   :  { %882 = vmatprep.mubr.f32.mxu0 %v6214_v2  ;;  %971 = vmatprep.mubr.f32.mxu1 %v6214_v2  ;;  %v2030_v26 = vsel %vm2026_vm9, %v2025_v14, %v2019_v61 }
  0xba   :  { %4219 = vmatmul.mubr.msk.f32.gmra.mxu0 %vm76_vm3, %v4213_v1  ;;  %4225 = vmatmul.mubr.msk.f32.gmra.mxu1 %vm76_vm3, %v4213_v1  ;;  %v4888_v1 = vrot.slane %v4514_v11, %v1777_v37  ;;  %v2023_v15 = vpop.permute.xlu0 %2022  ;;  %v1771_v11 = vsel %vm1770_vm8, %v1767_v43, %v1769_v6  ;;  %v4261_v37 = vld [vmem:[%s6210_s1 + $0xd8] sm:$0xff]  ;;  %v2029_v6 = vsel %vm2026_vm9, %v2019_v61, %v2021_v60  ;;  %v4292_v43 = vld [vmem:[%s6209_s4 + $0x30] ss:$0 sm:$0xff] }
  0xbb   :  { %1120 = vmatprep.mubr.f32.mxu0 %v6214_v2  ;;  %1209 = vmatprep.mubr.f32.mxu1 %v6214_v2  ;;  %v2027_v44 = vsel %vm2026_vm9, %v2023_v15, %v2025_v14 }
  0xbc   :  { %6288 = vst [vmem:[#allocation30_spill] sm:$0xff] %v4888_v1  ;;  %v2049_v52 = vmul.f32 %v4292_v43, %v2027_v44 }
  0xbe   :  { %4232 = vmatmul.mubr.msk.f32.vlgmr.msra.gmra.mxu0 %vm76_vm3, %v4226_v29  ;;  %4238 = vmatmul.mubr.msk.f32.vlgmr.msra.gmra.mxu1 %vm76_vm3, %v4226_v29  ;;  %v1791_v29 = vmul.f32 %v4888_v1, %v1773_v25 }
  0xbf   :  { %4247 = vmatpush1.msk.msra.mxu0 %vm89_vm1, %v1279_v27  ;;  %4253 = vmatpush1.msk.msra.mxu1 %vm89_vm1, %v1281_v28  ;;  %v4291_v27 = vld [vmem:[%s6209_s4 + $0x28] ss:$0 sm:$0xff]  ;;  %v2028_v28 = vsel %vm2026_vm9, %v2021_v60, %v2023_v15  ;;  %v4297_v60 = vld [vmem:[%s6210_s1 + $0x118] sm:$0xff] }
  0xc0   :  { %1126 = vmatprep.mubr.f32.mxu0 %v6214_v2  ;;  %1215 = vmatprep.mubr.f32.mxu1 %v6214_v2  ;;  %v2048_v33 = vmul.f32 %v4291_v27, %v2028_v28 }
  0xc1   :  { %4268 = vmatprep.subr.msk.mxu1 %vm89_vm1, %v1538_v30  ;;  %4262 = vmatprep.subr.msk.mxu0 %vm89_vm1, %v1536_v31  ;;  %v1793_v30 = vmul.f32 %v4893_v3, %v1771_v11  ;;  %v4258_v31 = vld [vmem:[%s6210_s1 + $0xc0] sm:$0xff] }
  0xc2   :  { %4233 = vmatmul.mubr.msk.f32.gmra.mxu0 %vm76_vm3, %v4227_v32  ;;  %4239 = vmatmul.mubr.msk.f32.gmra.mxu1 %vm76_vm3, %v4227_v32  ;;  %v2050_v32 = vmul.f32 %v4293_v12, %v2030_v26 }
  0xc3   :  { %1132 = vmatprep.mubr.f32.mxu0 %v6214_v2  ;;  %1221 = vmatprep.mubr.f32.mxu1 %v6214_v2 }
  0xc6   :  { %4234 = vmatmul.mubr.msk.f32.gmra.mxu0 %vm76_vm3, %v4228_v35  ;;  %4240 = vmatmul.mubr.msk.f32.gmra.mxu1 %vm76_vm3, %v4228_v35  ;;  %v4260_v35 = vld [vmem:[%s6210_s1 + $0xd0] sm:$0xff] }
  0xc7   :  { %1138 = vmatprep.mubr.f32.mxu0 %v6214_v2  ;;  %1227 = vmatprep.mubr.f32.mxu1 %v6214_v2 }
  0xca   :  { %4235 = vmatmul.mubr.msk.f32.gmra.mxu0 %vm76_vm3, %v4229_v42  ;;  %4241 = vmatmul.mubr.msk.f32.gmra.mxu1 %vm76_vm3, %v4229_v42  ;;  %v4290_v42 = vld [vmem:[%s6209_s4 + $0x20] ss:$0 sm:$0xff] }
  0xcb   :  { %1376 = vmatprep.mubr.f32.mxu0 %v6214_v2  ;;  %1465 = vmatprep.mubr.f32.mxu1 %v6214_v2  ;;  %v2047_v49 = vmul.f32 %v4290_v42, %v2029_v6 }
  0xce   :  { %4248 = vmatmul.mubr.msk.f32.vlgmr.msra.gmra.mxu0 %vm76_vm3, %v4242_v8  ;;  %4254 = vmatmul.mubr.msk.f32.vlgmr.msra.gmra.mxu1 %vm76_vm3, %v4242_v8  ;;  %v4277_v8 = vld [vmem:[%s6210_s1 + $0xf8] sm:$0xff] }
  0xcf   :  { %4263 = vmatpush1.msk.msra.mxu0 %vm89_vm1, %v1535_v56  ;;  %4269 = vmatpush1.msk.msra.mxu1 %vm89_vm1, %v1537_v57  ;;  %v4275_v56 = vld [vmem:[%s6210_s1 + $0xe8] sm:$0xff]  ;;  %v4276_v57 = vld [vmem:[%s6210_s1 + $0xf0] sm:$0xff] }
  0xd0   :  { %1382 = vmatprep.mubr.f32.mxu0 %v6214_v2  ;;  %1471 = vmatprep.mubr.f32.mxu1 %v6214_v2 }
  0xd1   :  { %4284 = vmatprep.subr.msk.mxu1 %vm89_vm1, %v1794_v10  ;;  %4278 = vmatprep.subr.msk.mxu0 %vm89_vm1, %v1792_v58  ;;  %v4294_v10 = vld [vmem:[%s6210_s1 + $0x100] sm:$0xff]  ;;  %v4295_v58 = vld [vmem:[%s6210_s1 + $0x108] sm:$0xff] }
  0xd2   :  { %4249 = vmatmul.mubr.msk.f32.gmra.mxu0 %vm76_vm3, %v4243_v59  ;;  %4255 = vmatmul.mubr.msk.f32.gmra.mxu1 %vm76_vm3, %v4243_v59  ;;  %v4296_v59 = vld [vmem:[%s6210_s1 + $0x110] sm:$0xff] }
  0xd3   :  { %1388 = vmatprep.mubr.f32.mxu0 %v6214_v2  ;;  %1477 = vmatprep.mubr.f32.mxu1 %v6214_v2 }
  0xd6   :  { %4250 = vmatmul.mubr.msk.f32.gmra.mxu0 %vm76_vm3, %v4244_v62  ;;  %4256 = vmatmul.mubr.msk.f32.gmra.mxu1 %vm76_vm3, %v4244_v62 }
  0xd7   :  { %1394 = vmatprep.mubr.f32.mxu0 %v6214_v2  ;;  %1483 = vmatprep.mubr.f32.mxu1 %v6214_v2 }
  0xda   :  { %4251 = vmatmul.mubr.msk.f32.gmra.mxu0 %vm76_vm3, %v4245_v13  ;;  %4257 = vmatmul.mubr.msk.f32.gmra.mxu1 %vm76_vm3, %v4245_v13 }
  0xdb   :  { %1632 = vmatprep.mubr.f32.mxu0 %v6214_v2  ;;  %1721 = vmatprep.mubr.f32.mxu1 %v6214_v2 }
  0xde   :  { %4264 = vmatmul.mubr.msk.f32.vlgmr.msra.gmra.mxu0 %vm76_vm3, %v4258_v31  ;;  %4270 = vmatmul.mubr.msk.f32.vlgmr.msra.gmra.mxu1 %vm76_vm3, %v4258_v31 }
  0xdf   :  { %4279 = vmatpush1.msk.msra.mxu0 %vm89_vm1, %v1791_v29  ;;  %4285 = vmatpush1.msk.msra.mxu1 %vm89_vm1, %v1793_v30 }
  0xe0   :  { %1638 = vmatprep.mubr.f32.mxu0 %v6214_v2  ;;  %1727 = vmatprep.mubr.f32.mxu1 %v6214_v2 }
  0xe1   :  { %4304 = vmatprep.subr.msk.mxu1 %vm89_vm1, %v2050_v32  ;;  %4298 = vmatprep.subr.msk.mxu0 %vm89_vm1, %v2048_v33 }
  0xe2   :  { %4265 = vmatmul.mubr.msk.f32.gmra.mxu0 %vm76_vm3, %v4259_v34  ;;  %4271 = vmatmul.mubr.msk.f32.gmra.mxu1 %vm76_vm3, %v4259_v34 }
  0xe3   :  { %1644 = vmatprep.mubr.f32.mxu0 %v6214_v2  ;;  %1733 = vmatprep.mubr.f32.mxu1 %v6214_v2 }
  0xe6   :  { %4266 = vmatmul.mubr.msk.f32.gmra.mxu0 %vm76_vm3, %v4260_v35  ;;  %4272 = vmatmul.mubr.msk.f32.gmra.mxu1 %vm76_vm3, %v4260_v35 }
  0xe7   :  { %1650 = vmatprep.mubr.f32.mxu0 %v6214_v2  ;;  %1739 = vmatprep.mubr.f32.mxu1 %v6214_v2 }
  0xea   :  { %4267 = vmatmul.mubr.msk.f32.gmra.mxu0 %vm76_vm3, %v4261_v37  ;;  %4273 = vmatmul.mubr.msk.f32.gmra.mxu1 %vm76_vm3, %v4261_v37 }
  0xeb   :  { %1888 = vmatprep.mubr.f32.mxu0 %v6214_v2  ;;  %1977 = vmatprep.mubr.f32.mxu1 %v6214_v2 }
  0xee   :  { %4280 = vmatmul.mubr.msk.f32.vlgmr.msra.gmra.mxu0 %vm76_vm3, %v4274_v55  ;;  %4286 = vmatmul.mubr.msk.f32.vlgmr.msra.gmra.mxu1 %vm76_vm3, %v4274_v55 }
  0xef   :  { %4299 = vmatpush1.msk.msra.mxu0 %vm89_vm1, %v2047_v49  ;;  %4305 = vmatpush1.msk.msra.mxu1 %vm89_vm1, %v2049_v52 }
  0xf0   :  { %1894 = vmatprep.mubr.f32.mxu0 %v6214_v2  ;;  %1983 = vmatprep.mubr.f32.mxu1 %v6214_v2 }
  0xf2   :  { %4281 = vmatmul.mubr.msk.f32.gmra.mxu0 %vm76_vm3, %v4275_v56  ;;  %4287 = vmatmul.mubr.msk.f32.gmra.mxu1 %vm76_vm3, %v4275_v56 }
  0xf3   :  { %1900 = vmatprep.mubr.f32.mxu0 %v6214_v2  ;;  %1989 = vmatprep.mubr.f32.mxu1 %v6214_v2 }
  0xf6   :  { %4282 = vmatmul.mubr.msk.f32.gmra.mxu0 %vm76_vm3, %v4276_v57  ;;  %4288 = vmatmul.mubr.msk.f32.gmra.mxu1 %vm76_vm3, %v4276_v57 }
  0xf7   :  { %1906 = vmatprep.mubr.f32.mxu0 %v6214_v2  ;;  %1995 = vmatprep.mubr.f32.mxu1 %v6214_v2 }
  0xfa   :  { %4283 = vmatmul.mubr.msk.f32.gmra.mxu0 %vm76_vm3, %v4277_v8  ;;  %4289 = vmatmul.mubr.msk.f32.gmra.mxu1 %vm76_vm3, %v4277_v8 }
  0xfb   :  { %2144 = vmatprep.mubr.f32.mxu0 %v6214_v2  ;;  %2233 = vmatprep.mubr.f32.mxu1 %v6214_v2 }
  0xfe   :  { %4300 = vmatmul.mubr.msk.f32.vlgmr.msra.gmra.mxu0 %vm76_vm3, %v4294_v10  ;;  %4306 = vmatmul.mubr.msk.f32.vlgmr.msra.gmra.mxu1 %vm76_vm3, %v4294_v10 }
  0xff   :  { %2150 = vmatprep.mubr.f32.mxu0 %v6214_v2  ;;  %2239 = vmatprep.mubr.f32.mxu1 %v6214_v2 }
 0x102   :  { %4301 = vmatmul.mubr.msk.f32.gmra.mxu0 %vm76_vm3, %v4295_v58  ;;  %4307 = vmatmul.mubr.msk.f32.gmra.mxu1 %vm76_vm3, %v4295_v58 }
 0x103   :  { %2156 = vmatprep.mubr.f32.mxu0 %v6214_v2  ;;  %2245 = vmatprep.mubr.f32.mxu1 %v6214_v2 }
 0x106   :  { %4302 = vmatmul.mubr.msk.f32.gmra.mxu0 %vm76_vm3, %v4296_v59  ;;  %4308 = vmatmul.mubr.msk.f32.gmra.mxu1 %vm76_vm3, %v4296_v59 }
 0x107   :  { %2162 = vmatprep.mubr.f32.mxu0 %v6214_v2  ;;  %2251 = vmatprep.mubr.f32.mxu1 %v6214_v2 }
 0x10a   :  { %4303 = vmatmul.mubr.msk.f32.gmra.mxu0 %vm76_vm3, %v4297_v60  ;;  %4309 = vmatmul.mubr.msk.f32.gmra.mxu1 %vm76_vm3, %v4297_v60 }
 0x10b   :  { %2364 = vmatprep.mubr.f32.mxu0 %v6214_v2  ;;  %2435 = vmatprep.mubr.f32.mxu1 %v6214_v2 }
 0x13e   :  { %v168_v61 = vpop.f32.mrf.mxu0  ;;  %v257_v62 = vpop.f32.mrf.mxu1 }
 0x140   :  { %v170_v13 = vpop.f32.mrf.mxu0  ;;  %v259_v14 = vpop.f32.mrf.mxu1 }
 0x142   :  { %v174_v15 = vpop.f32.mrf.mxu0  ;;  %v263_v25 = vpop.f32.mrf.mxu1 }
 0x144   :  { %v176_v11 = vpop.f32.mrf.mxu0  ;;  %v265_v12 = vpop.f32.mrf.mxu1 }
 0x146   :  { %v180_v26 = vpop.f32.mrf.mxu0  ;;  %v269_v27 = vpop.f32.mrf.mxu1 }
 0x148   :  { %v182_v28 = vpop.f32.mrf.mxu0  ;;  %v271_v29 = vpop.f32.mrf.mxu1 }
 0x14a   :  { %v186_v30 = vpop.f32.mrf.mxu0  ;;  %v275_v31 = vpop.f32.mrf.mxu1 }
 0x14c   :  { %v188_v32 = vpop.f32.mrf.mxu0  ;;  %v277_v33 = vpop.f32.mrf.mxu1 }
 0x14e   :  { %v370_v34 = vpop.f32.mrf.mxu0  ;;  %v459_v35 = vpop.f32.mrf.mxu1 }
 0x14f   :  { %v371_v37 = vadd.f32 %v370_v34, %v168_v61  ;;  %v460_v42 = vadd.f32 %v459_v35, %v257_v62 }
 0x150   :  { %v372_v6 = vpop.f32.mrf.mxu0  ;;  %v461_v43 = vpop.f32.mrf.mxu1 }
 0x151   :  { %v373_v44 = vadd.f32 %v372_v6, %v170_v13  ;;  %v462_v49 = vadd.f32 %v461_v43, %v259_v14 }
 0x152   :  { %v376_v52 = vpop.f32.mrf.mxu0  ;;  %v465_v55 = vpop.f32.mrf.mxu1 }
 0x153   :  { %v377_v56 = vadd.f32 %v376_v52, %v174_v15  ;;  %v466_v57 = vadd.f32 %v465_v55, %v263_v25 }
 0x154   :  { %v378_v8 = vpop.f32.mrf.mxu0  ;;  %v467_v10 = vpop.f32.mrf.mxu1 }
 0x155   :  { %v379_v58 = vadd.f32 %v378_v8, %v176_v11  ;;  %v468_v59 = vadd.f32 %v467_v10, %v265_v12 }
 0x156   :  { %v382_v60 = vpop.f32.mrf.mxu0  ;;  %v471_v2 = vpop.f32.mrf.mxu1 }
 0x157   :  { %v383_v9 = vadd.f32 %v382_v60, %v180_v26  ;;  %v472_v50 = vadd.f32 %v471_v2, %v269_v27 }
 0x158   :  { %v384_v51 = vpop.f32.mrf.mxu0  ;;  %v473_v3 = vpop.f32.mrf.mxu1 }
 0x159   :  { %v385_v61 = vadd.f32 %v384_v51, %v182_v28  ;;  %v474_v62 = vadd.f32 %v473_v3, %v271_v29 }
 0x15a   :  { %v388_v34 = vpop.f32.mrf.mxu0  ;;  %v477_v35 = vpop.f32.mrf.mxu1 }
 0x15b   :  { %v389_v13 = vadd.f32 %v388_v34, %v186_v30  ;;  %v478_v14 = vadd.f32 %v477_v35, %v275_v31 }
 0x15c   :  { %v390_v6 = vpop.f32.mrf.mxu0  ;;  %v479_v43 = vpop.f32.mrf.mxu1 }
 0x15d   :  { %v391_v15 = vadd.f32 %v390_v6, %v188_v32  ;;  %v480_v25 = vadd.f32 %v479_v43, %v277_v33 }
 0x15e   :  { %v610_v52 = vpop.f32.mrf.mxu0  ;;  %v699_v55 = vpop.f32.mrf.mxu1 }
 0x15f   :  { %v722_v11 = vadd.f32 %v610_v52, %v371_v37  ;;  %v724_v12 = vadd.f32 %v699_v55, %v460_v42 }
 0x160   :  { %v612_v8 = vpop.f32.mrf.mxu0  ;;  %v701_v10 = vpop.f32.mrf.mxu1 }
 0x161   :  { %v723_v26 = vadd.f32 %v612_v8, %v373_v44  ;;  %v725_v2 = vadd.f32 %v701_v10, %v462_v49 }
 0x162   :  { %v616_v27 = vpop.f32.mrf.mxu0  ;;  %v705_v60 = vpop.f32.mrf.mxu1 }
 0x163   :  { %v726_v51 = vadd.f32 %v616_v27, %v377_v56  ;;  %v728_v3 = vadd.f32 %v705_v60, %v466_v57 }
 0x164   :  { %v618_v28 = vpop.f32.mrf.mxu0  ;;  %v707_v29 = vpop.f32.mrf.mxu1 }
 0x165   :  { %v727_v30 = vadd.f32 %v618_v28, %v379_v58  ;;  %v729_v31 = vadd.f32 %v707_v29, %v468_v59 }
 0x166   :  { %v622_v34 = vpop.f32.mrf.mxu0  ;;  %v711_v35 = vpop.f32.mrf.mxu1 }
 0x167   :  { %v730_v32 = vadd.f32 %v622_v34, %v383_v9  ;;  %v732_v33 = vadd.f32 %v711_v35, %v472_v50 }
 0x168   :  { %v624_v6 = vpop.f32.mrf.mxu0  ;;  %v713_v43 = vpop.f32.mrf.mxu1 }
 0x169   :  { %v731_v37 = vadd.f32 %v624_v6, %v385_v61  ;;  %v733_v42 = vadd.f32 %v713_v43, %v474_v62 }
 0x16a   :  { %v628_v52 = vpop.f32.mrf.mxu0  ;;  %v717_v55 = vpop.f32.mrf.mxu1 }
 0x16b   :  { %v734_v44 = vadd.f32 %v628_v52, %v389_v13  ;;  %v736_v49 = vadd.f32 %v717_v55, %v478_v14 }
 0x16c   :  { %v630_v8 = vpop.f32.mrf.mxu0  ;;  %v719_v10 = vpop.f32.mrf.mxu1 }
 0x16d   :  { %v735_v56 = vadd.f32 %v630_v8, %v391_v15  ;;  %v737_v57 = vadd.f32 %v719_v10, %v480_v25 }
 0x16e   :  { %v866_v27 = vpop.f32.mrf.mxu0  ;;  %v955_v60 = vpop.f32.mrf.mxu1 }
 0x16f   :  { %v5019_v58 = vadd.f32 %v866_v27, %v722_v11  ;;  %v5021_v59 = vadd.f32 %v955_v60, %v724_v12 }
 0x170   :  { %v868_v9 = vpop.f32.mrf.mxu0  ;;  %v957_v50 = vpop.f32.mrf.mxu1 }
 0x171   :  { %v5023_v28 = vadd.f32 %v868_v9, %v723_v26  ;;  %v5025_v61 = vadd.f32 %v957_v50, %v725_v2 }
 0x172   :  { %v872_v62 = vpop.f32.mrf.mxu0  ;;  %v961_v29 = vpop.f32.mrf.mxu1 }
 0x173   :  { %v982_v13 = vadd.f32 %v872_v62, %v726_v51  ;;  %v984_v14 = vadd.f32 %v961_v29, %v728_v3 }
 0x174   :  { %v874_v34 = vpop.f32.mrf.mxu0  ;;  %v963_v35 = vpop.f32.mrf.mxu1 }
 0x175   :  { %v983_v15 = vadd.f32 %v874_v34, %v727_v30  ;;  %v985_v25 = vadd.f32 %v963_v35, %v729_v31 }
 0x176   :  { %v878_v6 = vpop.f32.mrf.mxu0  ;;  %v967_v43 = vpop.f32.mrf.mxu1 }
 0x177   :  { %v986_v11 = vadd.f32 %v878_v6, %v730_v32  ;;  %v988_v52 = vadd.f32 %v967_v43, %v732_v33 }
 0x178   :  { %v880_v12 = vpop.f32.mrf.mxu0  ;;  %v969_v55 = vpop.f32.mrf.mxu1 }
 0x179   :  { %v5027_v8 = vadd.f32 %v880_v12, %v731_v37  ;;  %v5029_v26 = vadd.f32 %v969_v55, %v733_v42 }
 0x17a   :  { %v884_v2 = vpop.f32.mrf.mxu0  ;;  %v973_v10 = vpop.f32.mrf.mxu1 }
 0x17b   :  { %v5031_v27 = vadd.f32 %v884_v2, %v734_v44  ;;  %v5033_v51 = vadd.f32 %v973_v10, %v736_v49 }
 0x17c   :  { %v886_v3 = vpop.f32.mrf.mxu0  ;;  %v975_v60 = vpop.f32.mrf.mxu1 }
 0x17d   :  { %v5035_v30 = vadd.f32 %v886_v3, %v735_v56  ;;  %v5037_v31 = vadd.f32 %v975_v60, %v737_v57 }
 0x17e   :  { %v5039_v32 = vpop.f32.mrf.mxu0  ;;  %v5041_v33 = vpop.f32.mrf.mxu1 }
 0x180   :  { %v5043_v37 = vpop.f32.mrf.mxu0  ;;  %v5045_v42 = vpop.f32.mrf.mxu1 }
 0x182   :  { %v1128_v9 = vpop.f32.mrf.mxu0  ;;  %v1217_v50 = vpop.f32.mrf.mxu1 }
 0x183   :  { %v5047_v44 = vadd.f32 %v1128_v9, %v982_v13  ;;  %v5049_v49 = vadd.f32 %v1217_v50, %v984_v14 }
 0x184   :  { %v1130_v62 = vpop.f32.mrf.mxu0  ;;  %v1219_v29 = vpop.f32.mrf.mxu1 }
 0x185   :  { %v5051_v56 = vadd.f32 %v1130_v62, %v983_v15  ;;  %v5053_v57 = vadd.f32 %v1219_v29, %v985_v25 }
 0x186   :  { %v1134_v34 = vpop.f32.mrf.mxu0  ;;  %v1223_v35 = vpop.f32.mrf.mxu1 }
 0x187   :  { %v5055_v6 = vadd.f32 %v1134_v34, %v986_v11  ;;  %v5057_v43 = vadd.f32 %v1223_v35, %v988_v52 }
 0x188   :  { %v5059_v12 = vpop.f32.mrf.mxu0  ;;  %v5061_v55 = vpop.f32.mrf.mxu1 }
 0x18a   :  { %v5063_v13 = vpop.f32.mrf.mxu0  ;;  %v5065_v14 = vpop.f32.mrf.mxu1 }
 0x18c   :  { %v5067_v2 = vpop.f32.mrf.mxu0  ;;  %v5069_v15 = vpop.f32.mrf.mxu1 }
 0x18e   :  { %v1378_v25 = vpop.f32.mrf.mxu0  ;;  %v1467_v10 = vpop.f32.mrf.mxu1 }
 0x190   :  { %v1380_v3 = vpop.f32.mrf.mxu0  ;;  %v1469_v60 = vpop.f32.mrf.mxu1 }
 0x192   :  { %v5071_v11 = vpop.f32.mrf.mxu0  ;;  %v5073_v52 = vpop.f32.mrf.mxu1 }
 0x194   :  { %v5075_v9 = vpop.f32.mrf.mxu0  ;;  %v5077_v50 = vpop.f32.mrf.mxu1 }
 0x196   :  { %v5079_v62 = vpop.f32.mrf.mxu0  ;;  %v5081_v29 = vpop.f32.mrf.mxu1 }
 0x198   :  { %v5083_v34 = vpop.f32.mrf.mxu0  ;;  %v5085_v35 = vpop.f32.mrf.mxu1 }
 0x19a   :  { %v5087_v20 = vpop.f32.mrf.mxu0  ;;  %v5089_v1 = vpop.f32.mrf.mxu1 }
 0x19c   :  { %v5091_v21 = vpop.f32.mrf.mxu0  ;;  %v5093_v41 = vpop.f32.mrf.mxu1 }
 0x19e   :  { %v1634_v45 = vpop.f32.mrf.mxu0  ;;  %v1723_v40 = vpop.f32.mrf.mxu1 }
 0x1a0   :  { %v1636_v48 = vpop.f32.mrf.mxu0  ;;  %v1725_v0 = vpop.f32.mrf.mxu1 }
 0x1a2   :  { %v5095_v24 = vpop.f32.mrf.mxu0  ;;  %v5097_v63 = vpop.f32.mrf.mxu1 }
 0x1a3   :  { %6290 = vst [vmem:[#allocation32_spill] sm:$0xff] %v5095_v24  ;;  %6291 = vst [vmem:[#allocation33_spill] sm:$0xff] %v5097_v63 }
 0x1a4   :  { %v5099_v23 = vpop.f32.mrf.mxu0  ;;  %v5101_v38 = vpop.f32.mrf.mxu1 }
 0x1a5   :  { %6292 = vst [vmem:[#allocation34_spill] sm:$0xff] %v5099_v23  ;;  %6293 = vst [vmem:[#allocation35_spill] sm:$0xff] %v5101_v38 }
 0x1a6   :  { %v5103_v54 = vpop.f32.mrf.mxu0  ;;  %v5105_v39 = vpop.f32.mrf.mxu1 }
 0x1a7   :  { %6294 = vst [vmem:[#allocation36_spill] sm:$0xff] %v5103_v54  ;;  %6295 = vst [vmem:[#allocation37_spill] sm:$0xff] %v5105_v39 }
 0x1a8   :  { %v5107_v53 = vpop.f32.mrf.mxu0  ;;  %v5109_v4 = vpop.f32.mrf.mxu1 }
 0x1a9   :  { %6296 = vst [vmem:[#allocation38_spill] sm:$0xff] %v5107_v53  ;;  %6297 = vst [vmem:[#allocation39_spill] sm:$0xff] %v5109_v4 }
 0x1aa   :  { %v5111_v36 = vpop.f32.mrf.mxu0  ;;  %v5113_v5 = vpop.f32.mrf.mxu1 }
 0x1ab   :  { %6298 = vst [vmem:[#allocation40_spill] sm:$0xff] %v5111_v36  ;;  %6299 = vst [vmem:[#allocation41_spill] sm:$0xff] %v5113_v5 }
 0x1ac   :  { %v5115_v22 = vpop.f32.mrf.mxu0  ;;  %v5117_v46 = vpop.f32.mrf.mxu1 }
 0x1ad   :  { %6300 = vst [vmem:[#allocation42_spill] sm:$0xff] %v5115_v22  ;;  %6301 = vst [vmem:[#allocation43_spill] sm:$0xff] %v5117_v46  ;;  %v1234_v22 = vadd.f32 %v5039_v32, %v5019_v58 }
 0x1ae   :  { %v1890_v17 = vpop.f32.mrf.mxu0  ;;  %v1979_v47 = vpop.f32.mrf.mxu1 }
 0x1b0   :  { %v1892_v16 = vpop.f32.mrf.mxu0  ;;  %v1981_v19 = vpop.f32.mrf.mxu1 }
 0x1b2   :  { %v5119_v18 = vpop.f32.mrf.mxu0  ;;  %v5121_v7 = vpop.f32.mrf.mxu1 }
 0x1b3   :  { %6302 = vst [vmem:[#allocation44_spill] sm:$0xff] %v5119_v18  ;;  %6303 = vst [vmem:[#allocation45_spill] sm:$0xff] %v5121_v7  ;;  %v1236_v18 = vadd.f32 %v5041_v33, %v5021_v59  ;;  %v1235_v7 = vadd.f32 %v5043_v37, %v5023_v28 }
 0x1b4   :  { %v5123_v39 = vpop.f32.mrf.mxu0  ;;  %v5125_v54 = vpop.f32.mrf.mxu1 }
 0x1b5   :  { %6304 = vst [vmem:[#allocation46_spill] sm:$0xff] %v5123_v39  ;;  %6305 = vst [vmem:[#allocation47_spill] sm:$0xff] %v5125_v54  ;;  %v1490_v39 = vadd.f32 %v1378_v25, %v1234_v22  ;;  %v1491_v58 = vadd.f32 %v1380_v3, %v1235_v7 }
 0x1b6   :  { %v5127_v4 = vpop.f32.mrf.mxu0  ;;  %v5129_v53 = vpop.f32.mrf.mxu1 }
 0x1b7   :  { %6306 = vst [vmem:[#allocation48_spill] sm:$0xff] %v5127_v4  ;;  %6307 = vst [vmem:[#allocation49_spill] sm:$0xff] %v5129_v53  ;;  %v1237_v53 = vadd.f32 %v5045_v42, %v5025_v61  ;;  %v1492_v4 = vadd.f32 %v1467_v10, %v1236_v18  ;;  %v1746_v32 = vadd.f32 %v1634_v45, %v1490_v39 }
 0x1b8   :  { %v5133_v46 = vpop.f32.mrf.mxu0  ;;  %v5135_v5 = vpop.f32.mrf.mxu1  ;;  %v1747_v33 = vadd.f32 %v1636_v48, %v1491_v58  ;;  %v1243_v45 = vadd.f32 %v5059_v12, %v5027_v8  ;;  %v1496_v48 = vadd.f32 %v5073_v52, %v5049_v49  ;;  %v1498_v8 = vadd.f32 %v5079_v62, %v5055_v6  ;;  %v6312_v6 = vld [vmem:[#allocation32_spill] sm:$0xff]  ;;  %v6320_v62 = vld [vmem:[#allocation43_spill] sm:$0xff]  ;;  %v6322_v58 = vld [vmem:[#allocation37_spill] sm:$0xff] }
 0x1b9   :  { %6308 = vst [vmem:[#allocation50_spill] sm:$0xff] %v5133_v46  ;;  %6309 = vst [vmem:[#allocation51_spill] sm:$0xff] %v5135_v5  ;;  %v1493_v38 = vadd.f32 %v1469_v60, %v1237_v53  ;;  %v1748_v59 = vadd.f32 %v1723_v40, %v1492_v4  ;;  %v2002_v23 = vadd.f32 %v1890_v17, %v1746_v32 }
 0x1ba   :  { %v5141_v36 = vpop.f32.mrf.mxu0  ;;  %v5143_v54 = vpop.f32.mrf.mxu1  ;;  %v1245_v53 = vadd.f32 %v5061_v55, %v5029_v26  ;;  %v1246_v17 = vadd.f32 %v5063_v13, %v5031_v27  ;;  %v1500_v26 = vadd.f32 %v5081_v29, %v5057_v43  ;;  %v6313_v55 = vld [vmem:[#allocation33_spill] sm:$0xff] }
 0x1bb   :  { %6310 = vst [vmem:[#allocation52_spill] sm:$0xff] %v5141_v36  ;;  %6311 = vst [vmem:[#allocation53_spill] sm:$0xff] %v5143_v54  ;;  %v1749_v37 = vadd.f32 %v1725_v0, %v1493_v38  ;;  %v2004_v25 = vadd.f32 %v1979_v47, %v1748_v59  ;;  %v2003_v36 = vadd.f32 %v1892_v16, %v1747_v33  ;;  %v6323_v59 = vld [vmem:[#allocation39_spill] sm:$0xff] }
 0x1bc   :  { %v5147_v46 = vpop.f32.mrf.mxu0  ;;  %v5149_v5 = vpop.f32.mrf.mxu1  ;;  %v1247_v47 = vadd.f32 %v5067_v2, %v5035_v30  ;;  %v1494_v38 = vadd.f32 %v5071_v11, %v5047_v44  ;;  %v1501_v30 = vadd.f32 %v5085_v35, %v1245_v53  ;;  %v1752_v13 = vadd.f32 %v6313_v55, %v1496_v48 }
 0x1bd   :  { %v2005_v61 = vadd.f32 %v1981_v19, %v1749_v37  ;;  %v1248_v19 = vadd.f32 %v5065_v14, %v5033_v51  ;;  %v1499_v51 = vadd.f32 %v5083_v34, %v1243_v45  ;;  %v6314_v14 = vld [vmem:[#allocation34_spill] sm:$0xff]  ;;  %v6321_v34 = vld [vmem:[#allocation36_spill] sm:$0xff]  ;;  %v1756_v32 = vadd.f32 %v6322_v58, %v1500_v26 }
 0x1be   :  { %v2146_v28 = vpop.f32.mrf.mxu0  ;;  %v2235_v22 = vpop.f32.mrf.mxu1  ;;  %v1750_v43 = vadd.f32 %v6312_v6, %v1494_v38  ;;  %v1754_v35 = vadd.f32 %v6321_v34, %v1498_v8  ;;  %v1757_v33 = vadd.f32 %v6323_v59, %v1501_v30 }
 0x1bf   :  { %v2258_v54 = vadd.f32 %v2146_v28, %v2002_v23  ;;  %v2260_v7 = vadd.f32 %v2235_v22, %v2004_v25  ;;  %v1249_v23 = vadd.f32 %v5069_v15, %v5037_v31  ;;  %v1502_v31 = vadd.f32 %v5087_v20, %v1246_v17  ;;  %v6315_v20 = vld [vmem:[#allocation35_spill] sm:$0xff] }
 0x1c0   :  { %v2148_v63 = vpop.f32.mrf.mxu0  ;;  %v2237_v24 = vpop.f32.mrf.mxu1  ;;  %v1504_v42 = vadd.f32 %v5089_v1, %v1248_v19  ;;  %v6316_v1 = vld [vmem:[#allocation40_spill] sm:$0xff]  ;;  %v6329_v38 = vld [vmem:[#allocation51_spill] sm:$0xff] }
 0x1c1   :  { %v5151_v18 = vmax.f32 %v2258_v54, 0.0  ;;  %v2259_v39 = vadd.f32 %v2148_v63, %v2003_v36  ;;  %v2261_v54 = vadd.f32 %v2237_v24, %v2005_v61  ;;  %v1495_v63 = vadd.f32 %v5075_v9, %v5051_v56  ;;  %v6319_v9 = vld [vmem:[#allocation42_spill] sm:$0xff]  ;;  %v6327_v19 = vld [vmem:[#allocation48_spill] sm:$0xff] }
 0x1c2   :  { %v5159_v4 = vpop.f32.mrf.mxu0  ;;  %v5161_v16 = vpop.f32.mrf.mxu1  ;;  %v1497_v24 = vadd.f32 %v5077_v50, %v5053_v57  ;;  %v5187_v27 = vmax.f32 %v2260_v7, 0.0  ;;  %v1503_v56 = vadd.f32 %v5091_v21, %v1247_v47  ;;  %v1505_v57 = vadd.f32 %v5093_v41, %v1249_v23  ;;  %v6317_v21 = vld [vmem:[#allocation38_spill] sm:$0xff]  ;;  %v6318_v41 = vld [vmem:[#allocation41_spill] sm:$0xff]  ;;  %v6324_v28 = vld [vmem:[#allocation52_spill] sm:$0xff] }
 0x1c3   :  { %v5167_v36 = vmax.f32 %v2259_v39, 0.0  ;;  %2447 = vrot.lane.b32.xlu0 %v5151_v18, %s4370_s22  ;;  %v5198_v12 = vmax.f32 %v2261_v54, 0.0  ;;  %v1751_v2 = vadd.f32 %v6314_v14, %v1495_v63  ;;  %v1758_v10 = vadd.f32 %v6316_v1, %v1502_v31  ;;  %v6325_v61 = vld [vmem:[#allocation50_spill] sm:$0xff]  ;;  %v6326_v39 = vld [vmem:[#allocation53_spill] sm:$0xff] }
 0x1c4   :  { %v2154_v0 = vpop.f32.mrf.mxu0  ;;  %v5179_v40 = vpop.f32.mrf.mxu1  ;;  %v1753_v15 = vadd.f32 %v6315_v20, %v1497_v24  ;;  %v1755_v11 = vadd.f32 %v6317_v21, %v1499_v51  ;;  %v1760_v52 = vadd.f32 %v6318_v41, %v1504_v42  ;;  %v1759_v50 = vadd.f32 %v6319_v9, %v1503_v56  ;;  %v6328_v54 = vld [vmem:[#allocation49_spill] sm:$0xff]  ;;  %v6331_v42 = vld [vmem:[#allocation46_spill] sm:$0xff] }
 0x1c5   :  { %2455 = vrot.lane.b32.xlu1 %v5167_v36, %s4370_s22  ;;  %v1761_v29 = vadd.f32 %v6320_v62, %v1505_v57  ;;  %v2014_v22 = vadd.f32 %v6324_v28, %v1758_v10  ;;  %v2010_v47 = vadd.f32 %v6327_v19, %v1754_v35  ;;  %v2012_v23 = vadd.f32 %v6328_v54, %v1756_v32  ;;  %v6332_v57 = vld [vmem:[#allocation47_spill] sm:$0xff] }
 0x1c6   :  { %v2158_v44 = vpop.f32.mrf.mxu0  ;;  %v2247_v49 = vpop.f32.mrf.mxu1  ;;  %v2011_v7 = vadd.f32 %v6325_v61, %v1755_v11  ;;  %v2016_v45 = vadd.f32 %v6326_v39, %v1760_v52  ;;  %v2015_v53 = vadd.f32 %v5147_v46, %v1759_v50  ;;  %v2013_v48 = vadd.f32 %v6329_v38, %v1757_v33  ;;  %v6330_v46 = vld [vmem:[#allocation44_spill] sm:$0xff] }
 0x1c7   :  { %2463 = vrot.lane.b32.xlu0 %v5187_v27, %s4370_s22  ;;  %v2017_v17 = vadd.f32 %v5149_v5, %v1761_v29  ;;  %v2006_v5 = vadd.f32 %v6330_v46, %v1750_v43  ;;  %v2007_v56 = vadd.f32 %v6331_v42, %v1751_v2  ;;  %v2009_v6 = vadd.f32 %v6332_v57, %v1753_v15 }
 0x1c8   :  { %v2160_v3 = vpop.f32.mrf.mxu0  ;;  %v2249_v60 = vpop.f32.mrf.mxu1  ;;  %v2266_v14 = vadd.f32 %v2158_v44, %v2010_v47  ;;  %v2268_v20 = vadd.f32 %v2247_v49, %v2012_v23 }
 0x1c9   :  { %2471 = vrot.lane.b32.xlu1 %v5198_v12, %s4370_s22  ;;  %v2267_v26 = vadd.f32 %v2160_v3, %v2011_v7  ;;  %v2269_v55 = vadd.f32 %v2249_v60, %v2013_v48  ;;  %v6333_v3 = vld [vmem:[#allocation45_spill] sm:$0xff]  ;;  %v2263_v11 = vadd.f32 %v2154_v0, %v2007_v56  ;;  %v2262_v43 = vadd.f32 %v5159_v4, %v2006_v5 }
 0x1ca   :  { %v2164_v37 = vpop.f32.mrf.mxu0  ;;  %v2253_v25 = vpop.f32.mrf.mxu1  ;;  %v2008_v21 = vadd.f32 %v6333_v3, %v1752_v13  ;;  %v2265_v2 = vadd.f32 %v5179_v40, %v2009_v6  ;;  %v5253_v4 = vmax.f32 %v2266_v14, 0.0  ;;  %v5255_v0 = vmax.f32 %v2268_v20, 0.0 }
 0x1cb   :  { %2650 = vrot.lane.b32.xlu0 %v5151_v18, %s4371_s27  ;;  %v2270_v63 = vadd.f32 %v2164_v37, %v2014_v22  ;;  %v2272_v51 = vadd.f32 %v2253_v25, %v2016_v45  ;;  %v5241_v15 = vmax.f32 %v2267_v26, 0.0  ;;  %v5249_v60 = vmax.f32 %v2269_v55, 0.0 }
 0x1cc   :  { %v2166_v24 = vpop.f32.mrf.mxu0  ;;  %v2255_v8 = vpop.f32.mrf.mxu1  ;;  %v2264_v49 = vadd.f32 %v5161_v16, %v2008_v21  ;;  %v5259_v40 = vmax.f32 %v2263_v11, 0.0  ;;  %v2278_v16 = vmax.f32 %v2262_v43, 0.0  ;;  %v5264_v13 = vmax.f32 %v2265_v2, 0.0 }
 0x1cd   :  { %v2271_v30 = vadd.f32 %v2166_v24, %v2015_v53  ;;  %v2273_v31 = vadd.f32 %v2255_v8, %v2017_v17  ;;  %2658 = vrot.lane.b32.xlu1 %v5167_v36, %s4371_s27  ;;  %v5237_v41 = vmax.f32 %v2270_v63, 0.0  ;;  %v5243_v44 = vmax.f32 %v2272_v51, 0.0 }
 0x1ce   :  { %v2280_v52 = vmax.f32 %v2264_v49, 0.0  ;;  %v6347_v56 = vmov 0.0  }
 0x1cf   :  { %v5230_v1 = vmax.f32 %v2271_v30, 0.0  ;;  %v5232_v10 = vmax.f32 %v2273_v31, 0.0  ;;  %2666 = vrot.lane.b32.xlu0 %v5187_v27, %s4371_s27  ;;  %v4310_v31 = vld [vmem:[%s6211_s2 + $0x20] sm:$0xff] }
 0x1d1   :  { %2324 = vmatprep.subr.mxu0 %v5230_v1  ;;  %2674 = vrot.lane.b32.xlu1 %v5198_v12, %s4371_s27 }
 0x1d2   :  { %2395 = vmatprep.subr.mxu1 %v5232_v10  ;;  %2325 = vmatpush1.msra.mxu0 %v5237_v41 }
 0x1d3   :  { %2396 = vmatpush1.msra.mxu1 %v5243_v44  ;;  %2326 = vmatprep.subr.mxu0 %v5241_v15 }
 0x1d4   :  { %2853 = vrot.lane.b32.xlu0 %v5151_v18, %s4372_s0  ;;  %2397 = vmatprep.subr.mxu1 %v5249_v60 }
 0x1d5   :  { %2327 = vmatpush1.msra.mxu0 %v5253_v4  ;;  %2398 = vmatpush1.msra.mxu1 %v5255_v0 }
 0x1d6   :  { %2328 = vmatprep.subr.mxu0 %v5259_v40  ;;  %2861 = vrot.lane.b32.xlu1 %v5167_v36, %s4372_s0 }
 0x1d7   :  { %2399 = vmatprep.subr.mxu1 %v5264_v13  ;;  %2329 = vmatpush1.msra.mxu0 %v2278_v16 }
 0x1d8   :  { %2400 = vmatpush1.msra.mxu1 %v2280_v52  ;;  %2330 = vmatprep.subr.mxu0 %v5167_v36 }
 0x1d9   :  { %2869 = vrot.lane.b32.xlu0 %v5187_v27, %s4372_s0  ;;  %2401 = vmatprep.subr.mxu1 %v5198_v12 }
 0x1da   :  { %2331 = vmatpush1.msra.mxu0 %v5151_v18  ;;  %2402 = vmatpush1.msra.mxu1 %v5187_v27 }
 0x1db   :  { %2877 = vrot.lane.b32.xlu1 %v5198_v12, %s4372_s0  ;;  %4311 = vmatmul.mubr.msk.f32.vlgmr.msra.gmra.mxu0 %vm2296_vm10, %v4310_v31 }
 0x1dc   :  { %4312 = vmatmul.mubr.msk.f32.vlgmr.msra.gmra.mxu1 %vm2296_vm10, %v4310_v31  ;;  %2562 = vmatprep.mubr.f32.mxu0 %v6347_v56 }
 0x1dd   :  { %3056 = vrot.lane.b32.xlu0 %v5151_v18, %s4373_s28  ;;  %2633 = vmatprep.mubr.f32.mxu1 %v6347_v56 }
 0x1df   :  { %3064 = vrot.lane.b32.xlu1 %v5167_v36, %s4373_s28 }
 0x1e1   :  { %3072 = vrot.lane.b32.xlu0 %v5187_v27, %s4373_s28 }
 0x1e3   :  { %3080 = vrot.lane.b32.xlu1 %v5198_v12, %s4373_s28 }
 0x1e5   :  { %3259 = vrot.lane.b32.xlu0 %v5151_v18, %s4374_s29 }
 0x1e7   :  { %3267 = vrot.lane.b32.xlu1 %v5167_v36, %s4374_s29 }
 0x1e9   :  { %3275 = vrot.lane.b32.xlu0 %v5187_v27, %s4374_s29 }
 0x1eb   :  { %3283 = vrot.lane.b32.xlu1 %v5198_v12, %s4374_s29 }
 0x1ed   :  { %3462 = vrot.lane.b32.xlu0 %v5151_v18, %s4375_s30 }
 0x1ef   :  { %3470 = vrot.lane.b32.xlu1 %v5167_v36, %s4375_s30 }
 0x1f1   :  { %3478 = vrot.lane.b32.xlu0 %v5187_v27, %s4375_s30 }
 0x1f3   :  { %3486 = vrot.lane.b32.xlu1 %v5198_v12, %s4375_s30 }
 0x1f5   :  { %3665 = vrot.lane.b32.xlu0 %v5151_v18, %s4376_s6 }
 0x1f7   :  { %3673 = vrot.lane.b32.xlu1 %v5167_v36, %s4376_s6 }
 0x1f9   :  { %3681 = vrot.lane.b32.xlu0 %v5187_v27, %s4376_s6 }
 0x1fb   :  { %3689 = vrot.lane.b32.xlu1 %v5198_v12, %s4376_s6 }
 0x1fd   :  { %2449 = vrot.lane.b32.xlu0 %v2278_v16, %s4370_s22 }
 0x1ff   :  { %2457 = vrot.lane.b32.xlu1 %v5259_v40, %s4370_s22 }
 0x201   :  { %2465 = vrot.lane.b32.xlu0 %v2280_v52, %s4370_s22 }
 0x203   :  { %2473 = vrot.lane.b32.xlu1 %v5264_v13, %s4370_s22 }
 0x205   :  { %2652 = vrot.lane.b32.xlu0 %v2278_v16, %s4371_s27 }
 0x207   :  { %2660 = vrot.lane.b32.xlu1 %v5259_v40, %s4371_s27 }
 0x209   :  { %2668 = vrot.lane.b32.xlu0 %v2280_v52, %s4371_s27 }
 0x20b   :  { %2676 = vrot.lane.b32.xlu1 %v5264_v13, %s4371_s27 }
 0x20d   :  { %2855 = vrot.lane.b32.xlu0 %v2278_v16, %s4372_s0 }
 0x20f   :  { %2863 = vrot.lane.b32.xlu1 %v5259_v40, %s4372_s0 }
 0x211   :  { %2871 = vrot.lane.b32.xlu0 %v2280_v52, %s4372_s0 }
 0x213   :  { %2879 = vrot.lane.b32.xlu1 %v5264_v13, %s4372_s0 }
 0x215   :  { %3058 = vrot.lane.b32.xlu0 %v2278_v16, %s4373_s28 }
 0x217   :  { %3066 = vrot.lane.b32.xlu1 %v5259_v40, %s4373_s28 }
 0x219   :  { %3074 = vrot.lane.b32.xlu0 %v2280_v52, %s4373_s28 }
 0x21b   :  { %3082 = vrot.lane.b32.xlu1 %v5264_v13, %s4373_s28 }
 0x21d   :  { %3261 = vrot.lane.b32.xlu0 %v2278_v16, %s4374_s29 }
 0x21f   :  { %3269 = vrot.lane.b32.xlu1 %v5259_v40, %s4374_s29 }
 0x221   :  { %3277 = vrot.lane.b32.xlu0 %v2280_v52, %s4374_s29 }
 0x223   :  { %3285 = vrot.lane.b32.xlu1 %v5264_v13, %s4374_s29 }
 0x225   :  { %3464 = vrot.lane.b32.xlu0 %v2278_v16, %s4375_s30 }
 0x227   :  { %3472 = vrot.lane.b32.xlu1 %v5259_v40, %s4375_s30 }
 0x229   :  { %3480 = vrot.lane.b32.xlu0 %v2280_v52, %s4375_s30 }
 0x22b   :  { %3488 = vrot.lane.b32.xlu1 %v5264_v13, %s4375_s30 }
 0x22d   :  { %3667 = vrot.lane.b32.xlu0 %v2278_v16, %s4376_s6 }
 0x22f   :  { %3675 = vrot.lane.b32.xlu1 %v5259_v40, %s4376_s6 }
 0x231   :  { %3683 = vrot.lane.b32.xlu0 %v2280_v52, %s4376_s6 }
 0x233   :  { %3691 = vrot.lane.b32.xlu1 %v5264_v13, %s4376_s6 }
 0x235   :  { %3870 = vrot.lane.b32.xlu0 %v2278_v16, %s4377_s7  ;;  %v5355_v9 = vpop.permute.xlu0 %2447 }
 0x237   :  { %3878 = vrot.lane.b32.xlu1 %v5259_v40, %s4377_s7  ;;  %v5359_v50 = vpop.permute.xlu1 %2455 }
 0x239   :  { %3886 = vrot.lane.b32.xlu0 %v2280_v52, %s4377_s7  ;;  %v5362_v62 = vpop.permute.xlu0 %2463 }
 0x23b   :  { %3894 = vrot.lane.b32.xlu1 %v5264_v13, %s4377_s7  ;;  %v5366_v29 = vpop.permute.xlu1 %2471 }
 0x23d   :  { %2451 = vrot.lane.b32.xlu0 %v5253_v4, %s4370_s22  ;;  %v5370_v34 = vpop.permute.xlu0 %2650 }
 0x23f   :  { %2459 = vrot.lane.b32.xlu1 %v5241_v15, %s4370_s22  ;;  %v5374_v35 = vpop.permute.xlu1 %2658 }
 0x241   :  { %2467 = vrot.lane.b32.xlu0 %v5255_v0, %s4370_s22  ;;  %v5378_v58 = vpop.permute.xlu0 %2666 }
 0x243   :  { %2475 = vrot.lane.b32.xlu1 %v5249_v60, %s4370_s22  ;;  %v5382_v32 = vpop.permute.xlu1 %2674 }
 0x245   :  { %2654 = vrot.lane.b32.xlu0 %v5253_v4, %s4371_s27 }
 0x246   :  { %v5386_v59 = vpop.permute.xlu0 %2853 }
 0x247   :  { %2662 = vrot.lane.b32.xlu1 %v5241_v15, %s4371_s27 }
 0x248   :  { %v5390_v33 = vpop.permute.xlu1 %2861 }
 0x249   :  { %2670 = vrot.lane.b32.xlu0 %v5255_v0, %s4371_s27 }
 0x24b   :  { %v5394_v28 = vpop.permute.xlu0 %2869  ;;  %2678 = vrot.lane.b32.xlu1 %v5249_v60, %s4371_s27 }
 0x24d   :  { %v5398_v22 = vpop.permute.xlu1 %2877  ;;  %2857 = vrot.lane.b32.xlu0 %v5253_v4, %s4372_s0 }
 0x24f   :  { %v5402_v37 = vpop.permute.xlu0 %3056  ;;  %2865 = vrot.lane.b32.xlu1 %v5241_v15, %s4372_s0 }
 0x251   :  { %v5406_v25 = vpop.permute.xlu1 %3064  ;;  %2873 = vrot.lane.b32.xlu0 %v5255_v0, %s4372_s0 }
 0x253   :  { %v5410_v61 = vpop.permute.xlu0 %3072  ;;  %2881 = vrot.lane.b32.xlu1 %v5249_v60, %s4372_s0 }
 0x255   :  { %v5414_v7 = vpop.permute.xlu1 %3080  ;;  %3060 = vrot.lane.b32.xlu0 %v5253_v4, %s4373_s28 }
 0x257   :  { %v5418_v39 = vpop.permute.xlu0 %3259  ;;  %3068 = vrot.lane.b32.xlu1 %v5241_v15, %s4373_s28 }
 0x258   :  { %6334 = vst [vmem:[#allocation32_spill] sm:$0xff] %v5418_v39 }
 0x259   :  { %v5422_v45 = vpop.permute.xlu1 %3267  ;;  %3076 = vrot.lane.b32.xlu0 %v5255_v0, %s4373_s28 }
 0x25a   :  { %6335 = vst [vmem:[#allocation33_spill] sm:$0xff] %v5422_v45 }
 0x25b   :  { %v5426_v53 = vpop.permute.xlu0 %3275  ;;  %3084 = vrot.lane.b32.xlu1 %v5249_v60, %s4373_s28 }
 0x25c   :  { %6336 = vst [vmem:[#allocation34_spill] sm:$0xff] %v5426_v53 }
 0x25d   :  { %v5430_v17 = vpop.permute.xlu1 %3283  ;;  %3263 = vrot.lane.b32.xlu0 %v5253_v4, %s4374_s29 }
 0x25e   :  { %6337 = vst [vmem:[#allocation35_spill] sm:$0xff] %v5430_v17 }
 0x25f   :  { %v5434_v19 = vpop.permute.xlu0 %3462  ;;  %3271 = vrot.lane.b32.xlu1 %v5241_v15, %s4374_s29 }
 0x260   :  { %6338 = vst [vmem:[#allocation40_spill] sm:$0xff] %v5434_v19 }
 0x261   :  { %v5438_v47 = vpop.permute.xlu1 %3470  ;;  %3279 = vrot.lane.b32.xlu0 %v5255_v0, %s4374_s29 }
 0x262   :  { %6339 = vst [vmem:[#allocation38_spill] sm:$0xff] %v5438_v47 }
 0x263   :  { %v5442_v54 = vpop.permute.xlu0 %3478  ;;  %3287 = vrot.lane.b32.xlu1 %v5249_v60, %s4374_s29 }
 0x264   :  { %6340 = vst [vmem:[#allocation41_spill] sm:$0xff] %v5442_v54 }
 0x265   :  { %v5446_v23 = vpop.permute.xlu1 %3486  ;;  %3466 = vrot.lane.b32.xlu0 %v5253_v4, %s4375_s30 }
 0x266   :  { %6341 = vst [vmem:[#allocation42_spill] sm:$0xff] %v5446_v23 }
 0x267   :  { %v5450_v38 = vpop.permute.xlu0 %3665  ;;  %3474 = vrot.lane.b32.xlu1 %v5241_v15, %s4375_s30 }
 0x268   :  { %6342 = vst [vmem:[#allocation43_spill] sm:$0xff] %v5450_v38 }
 0x269   :  { %v5454_v48 = vpop.permute.xlu1 %3673  ;;  %3482 = vrot.lane.b32.xlu0 %v5255_v0, %s4375_s30 }
 0x26a   :  { %6343 = vst [vmem:[#allocation36_spill] sm:$0xff] %v5454_v48 }
 0x26b   :  { %v5458_v63 = vpop.permute.xlu0 %3681  ;;  %3490 = vrot.lane.b32.xlu1 %v5249_v60, %s4375_s30 }
 0x26c   :  { %6344 = vst [vmem:[#allocation37_spill] sm:$0xff] %v5458_v63 }
 0x26d   :  { %v5462_v24 = vpop.permute.xlu1 %3689  ;;  %3669 = vrot.lane.b32.xlu0 %v5253_v4, %s4376_s6 }
 0x26e   :  { %6345 = vst [vmem:[#allocation39_spill] sm:$0xff] %v5462_v24 }
 0x26f   :  { %v5466_v8 = vpop.permute.xlu0 %2449  ;;  %3677 = vrot.lane.b32.xlu1 %v5241_v15, %s4376_s6 }
 0x271   :  { %v5470_v26 = vpop.permute.xlu1 %2457  ;;  %3685 = vrot.lane.b32.xlu0 %v5255_v0, %s4376_s6 }
 0x273   :  { %v5474_v51 = vpop.permute.xlu0 %2465  ;;  %3693 = vrot.lane.b32.xlu1 %v5249_v60, %s4376_s6 }
 0x275   :  { %v5478_v30 = vpop.permute.xlu1 %2473  ;;  %3872 = vrot.lane.b32.xlu0 %v5253_v4, %s4377_s7 }
 0x276   :  { %v5489_v5 = vsel %vm47_vm0, %v5474_v51, %v5478_v30 }
 0x277   :  { %v2653_v42 = vpop.permute.xlu0 %2652  ;;  %3880 = vrot.lane.b32.xlu1 %v5241_v15, %s4377_s7 }
 0x279   :  { %v2661_v57 = vpop.permute.xlu1 %2660  ;;  %3888 = vrot.lane.b32.xlu0 %v5255_v0, %s4377_s7 }
 0x27a   :  { %v5501_v6 = vsel %vm490_vm2, %v2653_v42, %v2661_v57 }
 0x27b   :  { %v2669_v55 = vpop.permute.xlu0 %2668  ;;  %3896 = vrot.lane.b32.xlu1 %v5249_v60, %s4377_s7 }
 0x27c   :  { %v5507_v14 = vsel %vm490_vm2, %v2661_v57, %v2669_v55 }
 0x27d   :  { %v2677_v20 = vpop.permute.xlu1 %2676  ;;  %2453 = vrot.lane.b32.xlu0 %v5237_v41, %s4370_s22 }
 0x27e   :  { %v5513_v3 = vsel %vm490_vm2, %v2677_v20, %v2653_v42  ;;  %v5517_v21 = vsel %vm490_vm2, %v2669_v55, %v2677_v20 }
 0x27f   :  { %v2856_v11 = vpop.permute.xlu0 %2855  ;;  %2461 = vrot.lane.b32.xlu1 %v5230_v1, %s4370_s22 }
 0x281   :  { %v2864_v43 = vpop.permute.xlu1 %2863  ;;  %2469 = vrot.lane.b32.xlu0 %v5243_v44, %s4370_s22 }
 0x282   :  { %v5525_v2 = vsel %vm746_vm4, %v2856_v11, %v2864_v43 }
 0x283   :  { %v2872_v15 = vpop.permute.xlu0 %2871  ;;  %2477 = vrot.lane.b32.xlu1 %v5232_v10, %s4370_s22 }
 0x284   :  { %v5531_v49 = vsel %vm746_vm4, %v2864_v43, %v2872_v15 }
 0x285   :  { %v2880_v60 = vpop.permute.xlu1 %2879  ;;  %2656 = vrot.lane.b32.xlu0 %v5237_v41, %s4371_s27 }
 0x286   :  { %v5537_v4 = vsel %vm746_vm4, %v2880_v60, %v2856_v11  ;;  %v5541_v0 = vsel %vm746_vm4, %v2872_v15, %v2880_v60 }
 0x287   :  { %v3059_v40 = vpop.permute.xlu0 %3058  ;;  %2664 = vrot.lane.b32.xlu1 %v5230_v1, %s4371_s27 }
 0x289   :  { %v3067_v16 = vpop.permute.xlu1 %3066  ;;  %2672 = vrot.lane.b32.xlu0 %v5243_v44, %s4371_s27 }
 0x28a   :  { %v5549_v13 = vsel %vm1002_vm5, %v3059_v40, %v3067_v16 }
 0x28b   :  { %v3075_v52 = vpop.permute.xlu0 %3074  ;;  %2680 = vrot.lane.b32.xlu1 %v5232_v10, %s4371_s27 }
 0x28c   :  { %v5555_v31 = vsel %vm1002_vm5, %v3067_v16, %v3075_v52 }
 0x28d   :  { %v3083_v42 = vpop.permute.xlu1 %3082  ;;  %2859 = vrot.lane.b32.xlu0 %v5237_v41, %s4372_s0 }
 0x28e   :  { %v5561_v57 = vsel %vm1002_vm5, %v3083_v42, %v3059_v40  ;;  %v5565_v55 = vsel %vm1002_vm5, %v3075_v52, %v3083_v42 }
 0x28f   :  { %v3262_v20 = vpop.permute.xlu0 %3261  ;;  %2867 = vrot.lane.b32.xlu1 %v5230_v1, %s4372_s0 }
 0x291   :  { %v3270_v11 = vpop.permute.xlu1 %3269  ;;  %2875 = vrot.lane.b32.xlu0 %v5243_v44, %s4372_s0 }
 0x292   :  { %v5573_v43 = vsel %vm1258_vm6, %v3262_v20, %v3270_v11 }
 0x293   :  { %6348 = vst [vmem:[#allocation52_spill] sm:$0xff] %v5573_v43  ;;  %v3278_v15 = vpop.permute.xlu0 %3277  ;;  %2883 = vrot.lane.b32.xlu1 %v5232_v10, %s4372_s0 }
 0x294   :  { %v5579_v60 = vsel %vm1258_vm6, %v3270_v11, %v3278_v15 }
 0x295   :  { %6349 = vst [vmem:[#allocation50_spill] sm:$0xff] %v5579_v60  ;;  %v3286_v40 = vpop.permute.xlu1 %3285  ;;  %3062 = vrot.lane.b32.xlu0 %v5237_v41, %s4373_s28 }
 0x296   :  { %v5585_v16 = vsel %vm1258_vm6, %v3278_v15, %v3286_v40  ;;  %v5589_v52 = vsel %vm1258_vm6, %v3286_v40, %v3262_v20 }
 0x297   :  { %6350 = vst [vmem:[#allocation53_spill] sm:$0xff] %v5585_v16  ;;  %6351 = vst [vmem:[#allocation48_spill] sm:$0xff] %v5589_v52  ;;  %v3465_v42 = vpop.permute.xlu0 %3464  ;;  %3070 = vrot.lane.b32.xlu1 %v5230_v1, %s4373_s28 }
 0x299   :  { %v3473_v24 = vpop.permute.xlu1 %3472  ;;  %3078 = vrot.lane.b32.xlu0 %v5243_v44, %s4373_s28 }
 0x29a   :  { %v5597_v11 = vsel %vm1514_vm7, %v3465_v42, %v3473_v24 }
 0x29b   :  { %6352 = vst [vmem:[#allocation49_spill] sm:$0xff] %v5597_v11  ;;  %v3481_v38 = vpop.permute.xlu0 %3480  ;;  %3086 = vrot.lane.b32.xlu1 %v5232_v10, %s4373_s28 }
 0x29c   :  { %v5603_v20 = vsel %vm1514_vm7, %v3473_v24, %v3481_v38 }
 0x29d   :  { %6353 = vst [vmem:[#allocation51_spill] sm:$0xff] %v5603_v20  ;;  %v3489_v15 = vpop.permute.xlu1 %3488  ;;  %3265 = vrot.lane.b32.xlu0 %v5237_v41, %s4374_s29 }
 0x29e   :  { %v5609_v40 = vsel %vm1514_vm7, %v3481_v38, %v3489_v15  ;;  %v5613_v48 = vsel %vm1514_vm7, %v3489_v15, %v3465_v42 }
 0x29f   :  { %6354 = vst [vmem:[#allocation44_spill] sm:$0xff] %v5609_v40  ;;  %6355 = vst [vmem:[#allocation46_spill] sm:$0xff] %v5613_v48  ;;  %v3668_v63 = vpop.permute.xlu0 %3667  ;;  %3273 = vrot.lane.b32.xlu1 %v5230_v1, %s4374_s29 }
 0x2a1   :  { %v3676_v23 = vpop.permute.xlu1 %3675  ;;  %3281 = vrot.lane.b32.xlu0 %v5243_v44, %s4374_s29 }
 0x2a2   :  { %v5621_v24 = vsel %vm1770_vm8, %v3668_v63, %v3676_v23 }
 0x2a3   :  { %6356 = vst [vmem:[#allocation47_spill] sm:$0xff] %v5621_v24  ;;  %v3684_v19 = vpop.permute.xlu0 %3683  ;;  %3289 = vrot.lane.b32.xlu1 %v5232_v10, %s4374_s29 }
 0x2a4   :  { %v5627_v38 = vsel %vm1770_vm8, %v3676_v23, %v3684_v19 }
 0x2a5   :  { %6357 = vst [vmem:[#allocation45_spill] sm:$0xff] %v5627_v38  ;;  %v3692_v42 = vpop.permute.xlu1 %3691  ;;  %3468 = vrot.lane.b32.xlu0 %v5237_v41, %s4375_s30 }
 0x2a6   :  { %v5633_v15 = vsel %vm1770_vm8, %v3684_v19, %v3692_v42  ;;  %v5637_v40 = vsel %vm1770_vm8, %v3692_v42, %v3668_v63 }
 0x2a7   :  { %6358 = vst [vmem:[#allocation2_spill] sm:$0xff] %v5633_v15  ;;  %6359 = vst [vmem:[#allocation54_spill] sm:$0xff] %v5637_v40  ;;  %v3871_v24 = vpop.permute.xlu0 %3870  ;;  %3476 = vrot.lane.b32.xlu1 %v5230_v1, %s4375_s30 }
 0x2a9   :  { %v3879_v47 = vpop.permute.xlu1 %3878  ;;  %3484 = vrot.lane.b32.xlu0 %v5243_v44, %s4375_s30 }
 0x2aa   :  { %v5645_v23 = vsel %vm2026_vm9, %v3871_v24, %v3879_v47 }
 0x2ab   :  { %6360 = vst [vmem:[#allocation55_spill] sm:$0xff] %v5645_v23  ;;  %v3887_v38 = vpop.permute.xlu0 %3886  ;;  %3492 = vrot.lane.b32.xlu1 %v5232_v10, %s4375_s30 }
 0x2ac   :  { %v5651_v19 = vsel %vm2026_vm9, %v3879_v47, %v3887_v38 }
 0x2ad   :  { %6361 = vst [vmem:[#allocation56_spill] sm:$0xff] %v5651_v19  ;;  %v3895_v63 = vpop.permute.xlu1 %3894  ;;  %3671 = vrot.lane.b32.xlu0 %v5237_v41, %s4376_s6 }
 0x2ae   :  { %v5657_v42 = vsel %vm2026_vm9, %v3887_v38, %v3895_v63  ;;  %v5661_v15 = vsel %vm2026_vm9, %v3895_v63, %v3871_v24 }
 0x2af   :  { %6362 = vst [vmem:[#allocation57_spill] sm:$0xff] %v5657_v42  ;;  %6363 = vst [vmem:[#allocation58_spill] sm:$0xff] %v5661_v15  ;;  %v2452_v23 = vpop.permute.xlu0 %2451  ;;  %3679 = vrot.lane.b32.xlu1 %v5230_v1, %s4376_s6 }
 0x2b1   :  { %v2460_v40 = vpop.permute.xlu1 %2459  ;;  %3687 = vrot.lane.b32.xlu0 %v5243_v44, %s4376_s6 }
 0x2b2   :  { %v5669_v47 = vsel %vm47_vm0, %v2452_v23, %v2460_v40 }
 0x2b3   :  { %v2468_v19 = vpop.permute.xlu0 %2467  ;;  %3695 = vrot.lane.b32.xlu1 %v5232_v10, %s4376_s6 }
 0x2b4   :  { %v5675_v24 = vsel %vm47_vm0, %v2460_v40, %v2468_v19 }
 0x2b5   :  { %v2476_v38 = vpop.permute.xlu1 %2475  ;;  %3874 = vrot.lane.b32.xlu0 %v5237_v41, %s4377_s7 }
 0x2b6   :  { %v5681_v63 = vsel %vm47_vm0, %v2476_v38, %v2452_v23  ;;  %v5685_v42 = vsel %vm47_vm0, %v2468_v19, %v2476_v38 }
 0x2b7   :  { %v2655_v15 = vpop.permute.xlu0 %2654  ;;  %3882 = vrot.lane.b32.xlu1 %v5230_v1, %s4377_s7 }
 0x2b9   :  { %v2663_v54 = vpop.permute.xlu1 %2662  ;;  %3890 = vrot.lane.b32.xlu0 %v5243_v44, %s4377_s7 }
 0x2ba   :  { %v5693_v40 = vsel %vm490_vm2, %v2655_v15, %v2663_v54 }
 0x2bb   :  { %v2671_v41 = vpop.permute.xlu0 %2670  ;;  %3898 = vrot.lane.b32.xlu1 %v5232_v10, %s4377_s7 }
 0x2bc   :  { %v5699_v23 = vsel %vm490_vm2, %v2663_v54, %v2671_v41 }
 0x2bd   :  { %v2679_v19 = vpop.permute.xlu1 %2678  ;;  %3868 = vrot.lane.b32.xlu0 %v5151_v18, %s4377_s7 }
 0x2be   :  { %v5705_v1 = vsel %vm490_vm2, %v2679_v19, %v2655_v15  ;;  %v5709_v44 = vsel %vm490_vm2, %v2671_v41, %v2679_v19 }
 0x2bf   :  { %v2858_v38 = vpop.permute.xlu0 %2857  ;;  %3876 = vrot.lane.b32.xlu1 %v5167_v36, %s4377_s7 }
 0x2c1   :  { %v2866_v10 = vpop.permute.xlu1 %2865  ;;  %3884 = vrot.lane.b32.xlu0 %v5187_v27, %s4377_s7 }
 0x2c2   :  { %v5717_v54 = vsel %vm746_vm4, %v2858_v38, %v2866_v10 }
 0x2c3   :  { %v2874_v18 = vpop.permute.xlu0 %2873  ;;  %3892 = vrot.lane.b32.xlu1 %v5198_v12, %s4377_s7 }
 0x2c4   :  { %v5723_v15 = vsel %vm746_vm4, %v2866_v10, %v2874_v18 }
 0x2c5   :  { %v2882_v41 = vpop.permute.xlu1 %2881 }
 0x2c6   :  { %v5727_v36 = vsel %vm746_vm4, %v2882_v41, %v2858_v38  ;;  %v5731_v27 = vsel %vm746_vm4, %v2874_v18, %v2882_v41 }
 0x2c7   :  { %v3061_v19 = vpop.permute.xlu0 %3060 }
 0x2c9   :  { %v3069_v48 = vpop.permute.xlu1 %3068 }
 0x2ca   :  { %v5735_v11 = vsel %vm1002_vm5, %v3061_v19, %v3069_v48 }
 0x2cb   :  { %v3077_v12 = vpop.permute.xlu0 %3076 }
 0x2cc   :  { %v5739_v10 = vsel %vm1002_vm5, %v3069_v48, %v3077_v12 }
 0x2cd   :  { %v3085_v20 = vpop.permute.xlu1 %3084 }
 0x2ce   :  { %v5743_v38 = vsel %vm1002_vm5, %v3085_v20, %v3061_v19  ;;  %v5747_v18 = vsel %vm1002_vm5, %v3077_v12, %v3085_v20 }
 0x2cf   :  { %v3264_v41 = vpop.permute.xlu0 %3263 }
 0x2d1   :  { %v3272_v17 = vpop.permute.xlu1 %3271 }
 0x2d2   :  { %v5751_v39 = vsel %vm1258_vm6, %v3264_v41, %v3272_v17 }
 0x2d3   :  { %6364 = vst [vmem:[#allocation59_spill] sm:$0xff] %v5751_v39  ;;  %v3280_v16 = vpop.permute.xlu0 %3279 }
 0x2d4   :  { %v5755_v48 = vsel %vm1258_vm6, %v3272_v17, %v3280_v16 }
 0x2d5   :  { %v3288_v45 = vpop.permute.xlu1 %3287 }
 0x2d6   :  { %v5759_v19 = vsel %vm1258_vm6, %v3280_v16, %v3288_v45  ;;  %v5763_v20 = vsel %vm1258_vm6, %v3288_v45, %v3264_v41 }
 0x2d7   :  { %6365 = vst [vmem:[#allocation60_spill] sm:$0xff] %v5759_v19  ;;  %6366 = vst [vmem:[#allocation61_spill] sm:$0xff] %v5763_v20  ;;  %v3467_v12 = vpop.permute.xlu0 %3466 }
 0x2d9   :  { %v3475_v53 = vpop.permute.xlu1 %3474 }
 0x2da   :  { %v5767_v52 = vsel %vm1514_vm7, %v3467_v12, %v3475_v53 }
 0x2db   :  { %6367 = vst [vmem:[#allocation62_spill] sm:$0xff] %v5767_v52  ;;  %v3483_v43 = vpop.permute.xlu0 %3482 }
 0x2dc   :  { %v5771_v17 = vsel %vm1514_vm7, %v3475_v53, %v3483_v43 }
 0x2dd   :  { %6368 = vst [vmem:[#allocation63_spill] sm:$0xff] %v5771_v17  ;;  %v3491_v60 = vpop.permute.xlu1 %3490 }
 0x2de   :  { %v5775_v16 = vsel %vm1514_vm7, %v3483_v43, %v3491_v60  ;;  %v5779_v45 = vsel %vm1514_vm7, %v3491_v60, %v3467_v12 }
 0x2df   :  { %6369 = vst [vmem:[#allocation64_spill] sm:$0xff] %v5775_v16  ;;  %6370 = vst [vmem:[#allocation65_spill] sm:$0xff] %v5779_v45  ;;  %v3670_v41 = vpop.permute.xlu0 %3669 }
 0x2e1   :  { %v3678_v19 = vpop.permute.xlu1 %3677 }
 0x2e2   :  { %v5783_v20 = vsel %vm1770_vm8, %v3670_v41, %v3678_v19 }
 0x2e3   :  { %6371 = vst [vmem:[#allocation66_spill] sm:$0xff] %v5783_v20  ;;  %v3686_v52 = vpop.permute.xlu0 %3685 }
 0x2e4   :  { %v5787_v53 = vsel %vm1770_vm8, %v3678_v19, %v3686_v52 }
 0x2e5   :  { %6372 = vst [vmem:[#allocation67_spill] sm:$0xff] %v5787_v53  ;;  %v3694_v17 = vpop.permute.xlu1 %3693 }
 0x2e6   :  { %v5791_v43 = vsel %vm1770_vm8, %v3686_v52, %v3694_v17  ;;  %v5795_v60 = vsel %vm1770_vm8, %v3694_v17, %v3670_v41 }
 0x2e7   :  { %6373 = vst [vmem:[#allocation68_spill] sm:$0xff] %v5791_v43  ;;  %6374 = vst [vmem:[#allocation69_spill] sm:$0xff] %v5795_v60  ;;  %v3873_v12 = vpop.permute.xlu0 %3872 }
 0x2e9   :  { %v3881_v16 = vpop.permute.xlu1 %3880 }
 0x2ea   :  { %v5799_v45 = vsel %vm2026_vm9, %v3873_v12, %v3881_v16 }
 0x2eb   :  { %6375 = vst [vmem:[#allocation70_spill] sm:$0xff] %v5799_v45  ;;  %v3889_v20 = vpop.permute.xlu0 %3888 }
 0x2ec   :  { %v5803_v19 = vsel %vm2026_vm9, %v3881_v16, %v3889_v20 }
 0x2ed   :  { %6376 = vst [vmem:[#allocation71_spill] sm:$0xff] %v5803_v19  ;;  %v3897_v53 = vpop.permute.xlu1 %3896 }
 0x2ee   :  { %v5807_v52 = vsel %vm2026_vm9, %v3889_v20, %v3897_v53  ;;  %v5811_v17 = vsel %vm2026_vm9, %v3897_v53, %v3873_v12 }
 0x2ef   :  { %6377 = vst [vmem:[#allocation72_spill] sm:$0xff] %v5807_v52  ;;  %v2454_v41 = vpop.permute.xlu0 %2453 }
 0x2f1   :  { %v2462_v43 = vpop.permute.xlu1 %2461 }
 0x2f2   :  { %v2490_v60 = vsel %vm47_vm0, %v2454_v41, %v2462_v43 }
 0x2f3   :  { %2522 = vmatprep.subr.mxu0 %v2490_v60  ;;  %v2470_v45 = vpop.permute.xlu0 %2469  ;;  %v2488_v60 = vsel %vm47_vm0, %v5466_v8, %v5470_v26 }
 0x2f4   :  { %v2486_v20 = vsel %vm47_vm0, %v2462_v43, %v2470_v45 }
 0x2f5   :  { %v2478_v39 = vpop.permute.xlu1 %2477 }
 0x2f6   :  { %v2494_v16 = vsel %vm47_vm0, %v2478_v39, %v2454_v41  ;;  %v2482_v19 = vsel %vm47_vm0, %v2470_v45, %v2478_v39  ;;  %v2492_v39 = vsel %vm47_vm0, %v5478_v30, %v5466_v8  ;;  %v2446_v8 = vld [vmem:[%s6211_s2] sm:$0xff] }
 0x2f7   :  { %v2657_v52 = vpop.permute.xlu0 %2656  ;;  %2523 = vmatpush1.msra.mxu0 %v2494_v16  ;;  %2593 = vmatprep.subr.mxu1 %v2482_v19 }
 0x2f8   :  { %2524 = vmatprep.subr.mxu0 %v5669_v47  ;;  %2594 = vmatpush1.msra.mxu1 %v2486_v20  ;;  %v2484_v47 = vsel %vm47_vm0, %v5470_v26, %v5474_v51  ;;  %v2491_v26 = vsel %vm47_vm0, %v5366_v29, %v5355_v9  ;;  %v2479_v51 = vsel %vm47_vm0, %v5362_v62, %v5366_v29 }
 0x2f9   :  { %2525 = vmatpush1.msra.mxu0 %v5681_v63  ;;  %v2665_v53 = vpop.permute.xlu1 %2664  ;;  %2595 = vmatprep.subr.mxu1 %v5685_v42  ;;  %v2487_v42 = vsel %vm47_vm0, %v5355_v9, %v5359_v50 }
 0x2fa   :  { %2526 = vmatprep.subr.mxu0 %v2488_v60  ;;  %2596 = vmatpush1.msra.mxu1 %v5675_v24  ;;  %v2693_v9 = vsel %vm490_vm2, %v2657_v52, %v2665_v53  ;;  %v6380_v60 = vld [vmem:[#allocation50_spill] sm:$0xff] }
 0x2fb   :  { %v2673_v63 = vpop.permute.xlu0 %2672  ;;  %2527 = vmatpush1.msra.mxu0 %v2492_v39  ;;  %2597 = vmatprep.subr.mxu1 %v5489_v5  ;;  %v2483_v5 = vsel %vm47_vm0, %v5359_v50, %v5362_v62  ;;  %v6381_v39 = vld [vmem:[#allocation60_spill] sm:$0xff] }
 0x2fc   :  { %2528 = vmatprep.subr.mxu0 %v2487_v42  ;;  %2598 = vmatpush1.msra.mxu1 %v2484_v47  ;;  %v2689_v43 = vsel %vm490_vm2, %v2665_v53, %v2673_v63  ;;  %v6379_v53 = vld [vmem:[#allocation61_spill] sm:$0xff]  ;;  %v6383_v42 = vld [vmem:[#allocation48_spill] sm:$0xff] }
 0x2fd   :  { %2529 = vmatpush1.msra.mxu0 %v2491_v26  ;;  %v2681_v30 = vpop.permute.xlu1 %2680  ;;  %2599 = vmatprep.subr.mxu1 %v2479_v51  ;;  %v6385_v26 = vld [vmem:[#allocation33_spill] sm:$0xff]  ;;  %v4324_v51 = vld [vmem:[%s6211_s2 + $0x28] sm:$0xff] }
 0x2fe   :  { %v2697_v24 = vsel %vm490_vm2, %v2681_v30, %v2657_v52  ;;  %4313 = vmatmul.mubr.msk.f32.vlgmr.msra.gmra.mxu0 %vm2296_vm10, %v2446_v8  ;;  %2600 = vmatpush1.msra.mxu1 %v2483_v5  ;;  %v2685_v29 = vsel %vm490_vm2, %v2673_v63, %v2681_v30  ;;  %v6382_v63 = vld [vmem:[#allocation52_spill] sm:$0xff]  ;;  %v6386_v30 = vld [vmem:[#allocation53_spill] sm:$0xff] }
 0x2ff   :  { %2725 = vmatprep.subr.mxu0 %v2693_v9  ;;  %v2860_v45 = vpop.permute.xlu0 %2859  ;;  %4314 = vmatmul.mubr.msk.f32.vlgmr.msra.gmra.mxu1 %vm2296_vm10, %v2446_v8  ;;  %v6384_v8 = vld [vmem:[#allocation34_spill] sm:$0xff]  ;;  %v6387_v5 = vld [vmem:[#allocation32_spill] sm:$0xff] }
 0x300   :  { %2726 = vmatpush1.msra.mxu0 %v2697_v24  ;;  %2796 = vmatprep.subr.mxu1 %v2685_v29  ;;  %v3299_v24 = vsel %vm1258_vm6, %v6387_v5, %v6385_v26  ;;  %v6388_v29 = vld [vmem:[#allocation35_spill] sm:$0xff] }
 0x301   :  { %2727 = vmatprep.subr.mxu0 %v5693_v40  ;;  %2797 = vmatpush1.msra.mxu1 %v2689_v43  ;;  %v2868_v50 = vpop.permute.xlu1 %2867  ;;  %v2690_v40 = vsel %vm490_vm2, %v5370_v34, %v5374_v35 }
 0x302   :  { %2728 = vmatpush1.msra.mxu0 %v5705_v1  ;;  %2798 = vmatprep.subr.mxu1 %v5709_v44  ;;  %v4315_v1 = vld [vmem:[%s6211_s2 + $0x8] sm:$0xff] }
 0x303   :  { %2729 = vmatprep.subr.mxu0 %v5501_v6  ;;  %2799 = vmatpush1.msra.mxu1 %v5699_v23  ;;  %v2876_v62 = vpop.permute.xlu0 %2875  ;;  %v2694_v6 = vsel %vm490_vm2, %v5382_v32, %v5370_v34  ;;  %v2686_v34 = vsel %vm490_vm2, %v5374_v35, %v5378_v58 }
 0x304   :  { %2730 = vmatpush1.msra.mxu0 %v5513_v3  ;;  %2800 = vmatprep.subr.mxu1 %v5517_v21  ;;  %v2682_v21 = vsel %vm490_vm2, %v5378_v58, %v5382_v32  ;;  %v2896_v32 = vsel %vm746_vm4, %v2860_v45, %v2868_v50  ;;  %v2892_v19 = vsel %vm746_vm4, %v2868_v50, %v2876_v62 }
 0x305   :  { %2731 = vmatprep.subr.mxu0 %v2690_v40  ;;  %2801 = vmatpush1.msra.mxu1 %v5507_v14  ;;  %v2884_v3 = vpop.permute.xlu1 %2883  ;;  %v3291_v50 = vsel %vm1258_vm6, %v6384_v8, %v6388_v29 }
 0x306   :  { %2732 = vmatpush1.msra.mxu0 %v2694_v6  ;;  %2765 = vmatprep.mubr.f32.mxu0 %v6347_v56  ;;  %v2900_v23 = vsel %vm746_vm4, %v2884_v3, %v2860_v45  ;;  %v2888_v44 = vsel %vm746_vm4, %v2876_v62, %v2884_v3  ;;  %v3303_v45 = vsel %vm1258_vm6, %v6388_v29, %v6387_v5  ;;  %v6389_v3 = vld [vmem:[#allocation63_spill] sm:$0xff]  ;;  %v6415_v29 = vld [vmem:[#allocation56_spill] sm:$0xff] }
 0x307   :  { %2802 = vmatprep.subr.mxu1 %v2682_v21  ;;  %4316 = vmatmul.mubr.msk.f32.vlgmr.msra.gmra.mxu0 %vm2296_vm10, %v4315_v1  ;;  %v3063_v14 = vpop.permute.xlu0 %3062 }
 0x308   :  { %2803 = vmatpush1.msra.mxu1 %v2686_v34  ;;  %2836 = vmatprep.mubr.f32.mxu1 %v6347_v56  ;;  %v6391_v34 = vld [vmem:[#allocation65_spill] sm:$0xff] }
 0x309   :  { %2928 = vmatprep.subr.mxu0 %v2896_v32  ;;  %4317 = vmatmul.mubr.msk.f32.vlgmr.msra.gmra.mxu1 %vm2296_vm10, %v4315_v1  ;;  %v3071_v12 = vpop.permute.xlu1 %3070 }
 0x30a   :  { %2929 = vmatpush1.msra.mxu0 %v2900_v23  ;;  %2999 = vmatprep.subr.mxu1 %v2888_v44  ;;  %v6390_v23 = vld [vmem:[#allocation62_spill] sm:$0xff]  ;;  %v6393_v44 = vld [vmem:[#allocation64_spill] sm:$0xff] }
 0x30b   :  { %2930 = vmatprep.subr.mxu0 %v5717_v54  ;;  %3000 = vmatpush1.msra.mxu1 %v2892_v19  ;;  %v3079_v35 = vpop.permute.xlu0 %3078  ;;  %v2893_v54 = vsel %vm746_vm4, %v5386_v59, %v5390_v33  ;;  %v6395_v19 = vld [vmem:[#allocation46_spill] sm:$0xff] }
 0x30c   :  { %2931 = vmatpush1.msra.mxu0 %v5727_v36  ;;  %3001 = vmatprep.subr.mxu1 %v5731_v27  ;;  %v4318_v36 = vld [vmem:[%s6211_s2 + $0x10] sm:$0xff]  ;;  %v3095_v41 = vsel %vm1002_vm5, %v3071_v12, %v3079_v35 }
 0x30d   :  { %2932 = vmatprep.subr.mxu0 %v5525_v2  ;;  %3002 = vmatpush1.msra.mxu1 %v5723_v15  ;;  %v3087_v58 = vpop.permute.xlu1 %3086  ;;  %v2897_v2 = vsel %vm746_vm4, %v5398_v22, %v5386_v59  ;;  %v2889_v59 = vsel %vm746_vm4, %v5390_v33, %v5394_v28 }
 0x30e   :  { %2933 = vmatpush1.msra.mxu0 %v5537_v4  ;;  %3003 = vmatprep.subr.mxu1 %v5541_v0  ;;  %v2885_v0 = vsel %vm746_vm4, %v5394_v28, %v5398_v22  ;;  %v3103_v15 = vsel %vm1002_vm5, %v3087_v58, %v3063_v14  ;;  %v3099_v22 = vsel %vm1002_vm5, %v3063_v14, %v3071_v12  ;;  %v6392_v14 = vld [vmem:[#allocation51_spill] sm:$0xff]  ;;  %v6394_v12 = vld [vmem:[#allocation49_spill] sm:$0xff] }
 0x30f   :  { %2934 = vmatprep.subr.mxu0 %v2893_v54  ;;  %3004 = vmatpush1.msra.mxu1 %v5531_v49  ;;  %v3266_v4 = vpop.permute.xlu0 %3265  ;;  %v3091_v49 = vsel %vm1002_vm5, %v3079_v35, %v3087_v58  ;;  %v6396_v35 = vld [vmem:[#allocation41_spill] sm:$0xff]  ;;  %v6397_v58 = vld [vmem:[#allocation38_spill] sm:$0xff] }
 0x310   :  { %2935 = vmatpush1.msra.mxu0 %v2897_v2  ;;  %2968 = vmatprep.mubr.f32.mxu0 %v6347_v56  ;;  %v3498_v54 = vsel %vm1514_vm7, %v6397_v58, %v6396_v35  ;;  %v6398_v2 = vld [vmem:[#allocation44_spill] sm:$0xff] }
 0x311   :  { %3005 = vmatprep.subr.mxu1 %v2885_v0  ;;  %4319 = vmatmul.mubr.msk.f32.vlgmr.msra.gmra.mxu0 %vm2296_vm10, %v4318_v36  ;;  %v3274_v27 = vpop.permute.xlu1 %3273 }
 0x312   :  { %3006 = vmatpush1.msra.mxu1 %v2889_v59  ;;  %3039 = vmatprep.mubr.f32.mxu1 %v6347_v56 }
 0x313   :  { %3131 = vmatprep.subr.mxu0 %v3099_v22  ;;  %4320 = vmatmul.mubr.msk.f32.vlgmr.msra.gmra.mxu1 %vm2296_vm10, %v4318_v36  ;;  %v3282_v52 = vpop.permute.xlu0 %3281  ;;  %v4327_v36 = vld [vmem:[%s6211_s2 + $0x30] sm:$0xff] }
 0x314   :  { %3132 = vmatpush1.msra.mxu0 %v3103_v15  ;;  %3202 = vmatprep.subr.mxu1 %v3091_v49  ;;  %v6400_v15 = vld [vmem:[#allocation42_spill] sm:$0xff] }
 0x315   :  { %3133 = vmatprep.subr.mxu0 %v5735_v11  ;;  %3203 = vmatpush1.msra.mxu1 %v3095_v41  ;;  %v3290_v33 = vpop.permute.xlu1 %3289  ;;  %v3096_v11 = vsel %vm1002_vm5, %v5402_v37, %v5406_v25 }
 0x316   :  { %3134 = vmatpush1.msra.mxu0 %v5743_v38  ;;  %3204 = vmatprep.subr.mxu1 %v5747_v18  ;;  %v4321_v38 = vld [vmem:[%s6211_s2 + $0x18] sm:$0xff]  ;;  %v3294_v16 = vsel %vm1258_vm6, %v3282_v52, %v3290_v33 }
 0x317   :  { %3135 = vmatprep.subr.mxu0 %v5549_v13  ;;  %3205 = vmatpush1.msra.mxu1 %v5739_v10  ;;  %v3469_v28 = vpop.permute.xlu0 %3468  ;;  %v3100_v13 = vsel %vm1002_vm5, %v5414_v7, %v5402_v37  ;;  %v3298_v10 = vsel %vm1258_vm6, %v3274_v27, %v3282_v52  ;;  %v3092_v37 = vsel %vm1002_vm5, %v5406_v25, %v5410_v61 }
 0x318   :  { %3136 = vmatpush1.msra.mxu0 %v5561_v57  ;;  %3206 = vmatprep.subr.mxu1 %v5565_v55  ;;  %v3088_v55 = vsel %vm1002_vm5, %v5410_v61, %v5414_v7  ;;  %v3302_v7 = vsel %vm1258_vm6, %v3266_v4, %v3274_v27  ;;  %v6378_v61 = vld [vmem:[#allocation59_spill] sm:$0xff]  ;;  %v3494_v27 = vsel %vm1514_vm7, %v6396_v35, %v6400_v15 }
 0x319   :  { %3137 = vmatprep.subr.mxu0 %v3096_v11  ;;  %3207 = vmatpush1.msra.mxu1 %v5555_v31  ;;  %v3477_v57 = vpop.permute.xlu1 %3476  ;;  %v3306_v31 = vsel %vm1258_vm6, %v3290_v33, %v3266_v4  ;;  %v6399_v4 = vld [vmem:[#allocation40_spill] sm:$0xff]  ;;  %v6401_v11 = vld [vmem:[#allocation67_spill] sm:$0xff] }
 0x31a   :  { %3138 = vmatpush1.msra.mxu0 %v3100_v13  ;;  %3171 = vmatprep.mubr.f32.mxu0 %v6347_v56  ;;  %v3505_v6 = vsel %vm1514_vm7, %v3469_v28, %v3477_v57  ;;  %v3502_v0 = vsel %vm1514_vm7, %v6399_v4, %v6397_v58  ;;  %v3506_v59 = vsel %vm1514_vm7, %v6400_v15, %v6399_v4  ;;  %v6403_v13 = vld [vmem:[#allocation69_spill] sm:$0xff] }
 0x31b   :  { %3208 = vmatprep.subr.mxu1 %v3088_v55  ;;  %4322 = vmatmul.mubr.msk.f32.vlgmr.msra.gmra.mxu0 %vm2296_vm10, %v4321_v38  ;;  %v3485_v18 = vpop.permute.xlu0 %3484  ;;  %v6405_v55 = vld [vmem:[#allocation68_spill] sm:$0xff] }
 0x31c   :  { %3209 = vmatpush1.msra.mxu1 %v3092_v37  ;;  %3242 = vmatprep.mubr.f32.mxu1 %v6347_v56  ;;  %v3501_v43 = vsel %vm1514_vm7, %v3477_v57, %v3485_v18  ;;  %v6404_v57 = vld [vmem:[#allocation45_spill] sm:$0xff]  ;;  %v6406_v37 = vld [vmem:[#allocation47_spill] sm:$0xff] }
 0x31d   :  { %3334 = vmatprep.subr.mxu0 %v3298_v10  ;;  %4323 = vmatmul.mubr.msk.f32.vlgmr.msra.gmra.mxu1 %vm2296_vm10, %v4321_v38  ;;  %v3493_v20 = vpop.permute.xlu1 %3492  ;;  %v6402_v38 = vld [vmem:[#allocation66_spill] sm:$0xff] }
 0x31e   :  { %3335 = vmatpush1.msra.mxu0 %v3302_v7  ;;  %3405 = vmatprep.subr.mxu1 %v3306_v31  ;;  %v3509_v62 = vsel %vm1514_vm7, %v3493_v20, %v3469_v28  ;;  %v3497_v1 = vsel %vm1514_vm7, %v3485_v18, %v3493_v20  ;;  %v6407_v31 = vld [vmem:[#allocation54_spill] sm:$0xff]  ;;  %v6408_v18 = vld [vmem:[#allocation37_spill] sm:$0xff] }
 0x31f   :  { %3336 = vmatprep.subr.mxu0 %v5755_v48  ;;  %3406 = vmatpush1.msra.mxu1 %v3294_v16  ;;  %v3672_v25 = vpop.permute.xlu0 %3671  ;;  %v3295_v48 = vsel %vm1258_vm6, %v6385_v26, %v6384_v8  ;;  %v6409_v16 = vld [vmem:[#allocation36_spill] sm:$0xff]  ;;  %v4330_v20 = vld [vmem:[%s6211_s2 + $0x38] sm:$0xff] }
 0x320   :  { %3337 = vmatpush1.msra.mxu0 %v6378_v61  ;;  %3407 = vmatprep.subr.mxu1 %v6379_v53  ;;  %v3701_v7 = vsel %vm1770_vm8, %v6409_v16, %v6408_v18  ;;  %v6411_v61 = vld [vmem:[#allocation43_spill] sm:$0xff] }
 0x321   :  { %3338 = vmatprep.subr.mxu0 %v6380_v60  ;;  %3408 = vmatpush1.msra.mxu1 %v6381_v39  ;;  %v3680_v47 = vpop.permute.xlu1 %3679  ;;  %v3705_v53 = vsel %vm1770_vm8, %v6411_v61, %v6409_v16  ;;  %v6412_v39 = vld [vmem:[#allocation39_spill] sm:$0xff] }
 0x322   :  { %3339 = vmatpush1.msra.mxu0 %v6382_v63  ;;  %3409 = vmatprep.subr.mxu1 %v6383_v42  ;;  %v3708_v33 = vsel %vm1770_vm8, %v3672_v25, %v3680_v47  ;;  %v3697_v42 = vsel %vm1770_vm8, %v6408_v18, %v6412_v39  ;;  %v6423_v16 = vld [vmem:[#allocation11_spill] sm:$0xff] }
 0x323   :  { %3340 = vmatprep.subr.mxu0 %v3295_v48  ;;  %3410 = vmatpush1.msra.mxu1 %v6386_v30  ;;  %v3688_v9 = vpop.permute.xlu0 %3687  ;;  %v6413_v30 = vld [vmem:[#allocation71_spill] sm:$0xff] }
 0x324   :  { %3341 = vmatpush1.msra.mxu0 %v3299_v24  ;;  %3374 = vmatprep.mubr.f32.mxu0 %v6347_v56  ;;  %v3704_v49 = vsel %vm1770_vm8, %v3680_v47, %v3688_v9  ;;  %v3709_v47 = vsel %vm1770_vm8, %v6412_v39, %v6411_v61  ;;  %v6414_v24 = vld [vmem:[#allocation70_spill] sm:$0xff]  ;;  %v6424_v61 = vld [vmem:[#allocation5_spill] sm:$0xff] }
 0x325   :  { %3411 = vmatprep.subr.mxu1 %v3303_v45  ;;  %4325 = vmatmul.mubr.msk.f32.vlgmr.msra.gmra.mxu0 %vm2296_vm10, %v4324_v51  ;;  %v3696_v40 = vpop.permute.xlu1 %3695  ;;  %v6416_v45 = vld [vmem:[#allocation72_spill] sm:$0xff] }
 0x326   :  { %3412 = vmatpush1.msra.mxu1 %v3291_v50  ;;  %3445 = vmatprep.mubr.f32.mxu1 %v6347_v56  ;;  %v3712_v22 = vsel %vm1770_vm8, %v3696_v40, %v3672_v25  ;;  %v3700_v41 = vsel %vm1770_vm8, %v3688_v9, %v3696_v40  ;;  %v6410_v25 = vld [vmem:[#allocation2_spill] sm:$0xff] }
 0x327   :  { %3537 = vmatprep.subr.mxu0 %v3501_v43  ;;  %4326 = vmatmul.mubr.msk.f32.vlgmr.msra.gmra.mxu1 %vm2296_vm10, %v4324_v51  ;;  %v3875_v21 = vpop.permute.xlu0 %3874  ;;  %v6417_v43 = vld [vmem:[#allocation55_spill] sm:$0xff]  ;;  %v6418_v50 = vld [vmem:[#allocation58_spill] sm:$0xff] }
 0x328   :  { %3538 = vmatpush1.msra.mxu0 %v3505_v6  ;;  %3608 = vmatprep.subr.mxu1 %v3509_v62  ;;  %v4333_v62 = vld [vmem:[%s6211_s2 + $0x40] sm:$0xff] }
 0x329   :  { %3539 = vmatprep.subr.mxu0 %v6389_v3  ;;  %3609 = vmatpush1.msra.mxu1 %v3497_v1  ;;  %v3883_v32 = vpop.permute.xlu1 %3882  ;;  %v6419_v1 = vld [vmem:[#allocation57_spill] sm:$0xff]  ;;  %v2366_v3 = vpop.f32.mrf.mxu0 }
 0x32a   :  { %3540 = vmatpush1.msra.mxu0 %v6390_v23  ;;  %3610 = vmatprep.subr.mxu1 %v6391_v34  ;;  %v3911_v48 = vsel %vm2026_vm9, %v3875_v21, %v3883_v32 }
 0x32b   :  { %3541 = vmatprep.subr.mxu0 %v6392_v14  ;;  %3611 = vmatpush1.msra.mxu1 %v6393_v44  ;;  %v3891_v52 = vpop.permute.xlu0 %3890  ;;  %v2368_v23 = vpop.f32.mrf.mxu0 }
 0x32c   :  { %3542 = vmatpush1.msra.mxu0 %v6394_v12  ;;  %3612 = vmatprep.subr.mxu1 %v6395_v19  ;;  %v3907_v63 = vsel %vm2026_vm9, %v3883_v32, %v3891_v52 }
 0x32d   :  { %3543 = vmatprep.subr.mxu0 %v3498_v54  ;;  %3613 = vmatpush1.msra.mxu1 %v6398_v2  ;;  %v3899_v28 = vpop.permute.xlu1 %3898 }
 0x32e   :  { %3544 = vmatpush1.msra.mxu0 %v3502_v0  ;;  %3577 = vmatprep.mubr.f32.mxu0 %v6347_v56  ;;  %v3915_v8 = vsel %vm2026_vm9, %v3899_v28, %v3875_v21  ;;  %v3903_v26 = vsel %vm2026_vm9, %v3891_v52, %v3899_v28  ;;  %v2437_v21 = vpop.f32.mrf.mxu1 }
 0x32f   :  { %3614 = vmatprep.subr.mxu1 %v3506_v59  ;;  %4328 = vmatmul.mubr.msk.f32.vlgmr.msra.gmra.mxu0 %vm2296_vm10, %v4327_v36  ;;  %v3869_v10 = vpop.permute.xlu0 %3868 }
 0x330   :  { %3615 = vmatpush1.msra.mxu1 %v3494_v27  ;;  %3648 = vmatprep.mubr.f32.mxu1 %v6347_v56  ;;  %v2439_v34 = vpop.f32.mrf.mxu1 }
 0x331   :  { %3740 = vmatprep.subr.mxu0 %v3704_v49  ;;  %4329 = vmatmul.mubr.msk.f32.vlgmr.msra.gmra.mxu1 %vm2296_vm10, %v4327_v36  ;;  %v3877_v60 = vpop.permute.xlu1 %3876 }
 0x332   :  { %3741 = vmatpush1.msra.mxu0 %v3708_v33  ;;  %3811 = vmatprep.subr.mxu1 %v3712_v22  ;;  %v2290_v22 = vld [vmem:[%s6212_s3] sm:$0xff] }
 0x333   :  { %3742 = vmatprep.subr.mxu0 %v6401_v11  ;;  %3812 = vmatpush1.msra.mxu1 %v3700_v41  ;;  %v3885_v51 = vpop.permute.xlu0 %3884  ;;  %v2292_v41 = vld [vmem:[%s6212_s3 + $0x10] sm:$0xff]  ;;  %v6420_v33 = vld [vmem:[#allocation6_spill] sm:$0xff] }
 0x334   :  { %3743 = vmatpush1.msra.mxu0 %v6402_v38  ;;  %3813 = vmatprep.subr.mxu1 %v6403_v13  ;;  %v3904_v9 = vsel %vm2026_vm9, %v3877_v60, %v3885_v51  ;;  %v2291_v38 = vld [vmem:[%s6212_s3 + $0x8] sm:$0xff] }
 0x335   :  { %3744 = vmatprep.subr.mxu0 %v6404_v57  ;;  %3814 = vmatpush1.msra.mxu1 %v6405_v55  ;;  %v3893_v5 = vpop.permute.xlu1 %3892  ;;  %v6421_v13 = vld [vmem:[#allocation7_spill] sm:$0xff] }
 0x336   :  { %3745 = vmatpush1.msra.mxu0 %v6406_v37  ;;  %3815 = vmatprep.subr.mxu1 %v6407_v31  ;;  %v3912_v40 = vsel %vm2026_vm9, %v3893_v5, %v3869_v10  ;;  %v3900_v6 = vsel %vm2026_vm9, %v3885_v51, %v3893_v5  ;;  %v2293_v37 = vld [vmem:[%s6212_s3 + $0x18] sm:$0xff]  ;;  %v6422_v31 = vld [vmem:[#allocation4_spill] sm:$0xff] }
 0x337   :  { %3746 = vmatprep.subr.mxu0 %v3701_v7  ;;  %3816 = vmatpush1.msra.mxu1 %v6410_v25  ;;  %v2444_v25 = vadd.f32 %v2437_v21, %v2292_v41  ;;  %v2445_v51 = vadd.f32 %v2439_v34, %v2293_v37  ;;  %v6428_v5 = vld [vmem:[#allocation9_spill] sm:$0xff] }
 0x338   :  { %3747 = vmatpush1.msra.mxu0 %v3705_v53  ;;  %3780 = vmatprep.mubr.f32.mxu0 %v6347_v56 }
 0x339   :  { %3817 = vmatprep.subr.mxu1 %v3709_v47  ;;  %4331 = vmatmul.mubr.msk.f32.vlgmr.msra.gmra.mxu0 %vm2296_vm10, %v4330_v20  ;;  %v2443_v47 = vadd.f32 %v2368_v23, %v2291_v38  ;;  %v6432_v23 = vld [vmem:[#allocation13_spill] sm:$0xff] }
 0x33a   :  { %3818 = vmatpush1.msra.mxu1 %v3697_v42  ;;  %3851 = vmatprep.mubr.f32.mxu1 %v6347_v56  ;;  %v6426_v42 = vld [vmem:[#allocation8_spill] sm:$0xff] }
 0x33b   :  { %3943 = vmatprep.subr.mxu0 %v3907_v63  ;;  %4332 = vmatmul.mubr.msk.f32.vlgmr.msra.gmra.mxu1 %vm2296_vm10, %v4330_v20 }
 0x33c   :  { %3944 = vmatpush1.msra.mxu0 %v3911_v48  ;;  %4014 = vmatprep.subr.mxu1 %v3915_v8 }
 0x33d   :  { %3945 = vmatprep.subr.mxu0 %v6413_v30  ;;  %4015 = vmatpush1.msra.mxu1 %v3903_v26  ;;  %v6427_v26 = vld [vmem:[#allocation15_spill] sm:$0xff] }
 0x33e   :  { %3946 = vmatpush1.msra.mxu0 %v6414_v24  ;;  %4016 = vmatprep.subr.mxu1 %v5811_v17  ;;  %v3908_v17 = vsel %vm2026_vm9, %v3869_v10, %v3877_v60  ;;  %v2442_v10 = vadd.f32 %v2366_v3, %v2290_v22  ;;  %v6425_v60 = vld [vmem:[#allocation10_spill] sm:$0xff] }
 0x33f   :  { %3947 = vmatprep.subr.mxu0 %v6415_v29  ;;  %4017 = vmatpush1.msra.mxu1 %v6416_v45 }
 0x340   :  { %3948 = vmatpush1.msra.mxu0 %v6417_v43  ;;  %4018 = vmatprep.subr.mxu1 %v6418_v50 }
 0x341   :  { %4019 = vmatpush1.msra.mxu1 %v6419_v1  ;;  %3949 = vmatprep.subr.mxu0 %v3904_v9  ;;  %v6429_v9 = vld [vmem:[#allocation14_spill] sm:$0xff] }
 0x342   :  { %3950 = vmatpush1.msra.mxu0 %v3908_v17  ;;  %3983 = vmatprep.mubr.f32.mxu0 %v6347_v56  ;;  %v6431_v17 = vld [vmem:[#allocation19_spill] sm:$0xff] }
 0x343   :  { %4334 = vmatmul.mubr.msk.f32.vlgmr.msra.gmra.mxu0 %vm2296_vm10, %v4333_v62  ;;  %4020 = vmatprep.subr.mxu1 %v3912_v40 }
 0x344   :  { %4021 = vmatpush1.msra.mxu1 %v3900_v6  ;;  %4054 = vmatprep.mubr.f32.mxu1 %v6347_v56 }
 0x345   :  { %4335 = vmatmul.mubr.msk.f32.vlgmr.msra.gmra.mxu1 %vm2296_vm10, %v4333_v62  ;;  %v6430_v62 = vld [vmem:[#allocation12_spill] sm:$0xff] }
 0x3be   :  { %v2564_v14 = vpop.f32.mrf.mxu0 }
 0x3bf   :  { %v2635_v44 = vpop.f32.mrf.mxu1  ;;  %v2640_v28 = vmul.f32 %v2564_v14, %v6420_v33 }
 0x3c0   :  { %v2566_v32 = vpop.f32.mrf.mxu0  ;;  %v2642_v57 = vmul.f32 %v2635_v44, %v6421_v13  ;;  %v6433_v44 = vld [vmem:[#allocation18_spill] sm:$0xff] }
 0x3c1   :  { %v2637_v46 = vpop.f32.mrf.mxu1  ;;  %v2641_v18 = vmul.f32 %v2566_v32, %v6422_v31  ;;  %v2644_v63 = vadd.f32 %v2640_v28, %v2442_v10  ;;  %v6439_v10 = vld [vmem:[#allocation26_spill] sm:$0xff] }
 0x3c2   :  { %v2643_v53 = vmul.f32 %v2637_v46, %v6424_v61  ;;  %v2646_v30 = vadd.f32 %v2642_v57, %v2444_v25  ;;  %v6438_v57 = vld [vmem:[#allocation21_spill] sm:$0xff] }
 0x3c3   :  { %v2645_v43 = vadd.f32 %v2641_v18, %v2443_v47  ;;  %v6440_v18 = vld [vmem:[#allocation20_spill] sm:$0xff] }
 0x3c4   :  { %v2647_v3 = vadd.f32 %v2643_v53, %v2445_v51  ;;  %v6442_v53 = vld [vmem:[#allocation25_spill] sm:$0xff] }
 0x3c5   :  { %v6446_v51 = vld [vmem:[#allocation29_spill] sm:$0xff] }
 0x3c7   :  { %v2767_v12 = vpop.f32.mrf.mxu0 }
 0x3c8   :  { %v2843_v7 = vmul.f32 %v2767_v12, %v6423_v16 }
 0x3c9   :  { %v2838_v19 = vpop.f32.mrf.mxu1  ;;  %v2769_v35 = vpop.f32.mrf.mxu0 }
 0x3ca   :  { %v2845_v39 = vmul.f32 %v2838_v19, %v6425_v60  ;;  %v2844_v8 = vmul.f32 %v2769_v35, %v6426_v42  ;;  %v2847_v50 = vadd.f32 %v2843_v7, %v2644_v63  ;;  %v6434_v19 = vld [vmem:[#allocation16_spill] sm:$0xff] }
 0x3cb   :  { %v2840_v58 = vpop.f32.mrf.mxu1  ;;  %v6444_v42 = vld [vmem:[#allocation24_spill] sm:$0xff] }
 0x3cc   :  { %v2846_v24 = vmul.f32 %v2840_v58, %v6428_v5  ;;  %v2849_v21 = vadd.f32 %v2845_v39, %v2646_v30  ;;  %v2848_v46 = vadd.f32 %v2844_v8, %v2645_v43  ;;  %v6435_v58 = vld [vmem:[#allocation22_spill] sm:$0xff]  ;;  %v6445_v8 = vld [vmem:[#allocation31_spill] sm:$0xff]  ;;  %v6447_v5 = vld [vmem:[#allocation28_spill] sm:$0xff] }
 0x3cd   :  { %v4365_v43 = vld [vmem:[%s6209_s4 + $0x20] ss:$0 sm:$0xff] }
 0x3ce   :  { %v2850_v22 = vadd.f32 %v2846_v24, %v2647_v3 }
 0x3d1   :  { %v2970_v54 = vpop.f32.mrf.mxu0 }
 0x3d2   :  { %v3046_v48 = vmul.f32 %v2970_v54, %v6427_v26 }
 0x3d3   :  { %v3041_v36 = vpop.f32.mrf.mxu1  ;;  %v2972_v2 = vpop.f32.mrf.mxu0 }
 0x3d4   :  { %v3048_v29 = vmul.f32 %v3041_v36, %v6429_v9  ;;  %v3047_v40 = vmul.f32 %v2972_v2, %v6430_v62  ;;  %v3050_v12 = vadd.f32 %v3046_v48, %v2847_v50  ;;  %v6436_v2 = vld [vmem:[#allocation17_spill] sm:$0xff] }
 0x3d5   :  { %v3043_v4 = vpop.f32.mrf.mxu1 }
 0x3d6   :  { %v3049_v14 = vmul.f32 %v3043_v4, %v6432_v23  ;;  %v3052_v41 = vadd.f32 %v3048_v29, %v2849_v21  ;;  %v3051_v38 = vadd.f32 %v3047_v40, %v2848_v46  ;;  %v4366_v21 = vld [vmem:[%s6209_s4 + $0x28] ss:$0 sm:$0xff] }
 0x3d8   :  { %v3053_v37 = vadd.f32 %v3049_v14, %v2850_v22  ;;  %v4367_v14 = vld [vmem:[%s6209_s4 + $0x30] ss:$0 sm:$0xff] }
 0x3db   :  { %v3173_v0 = vpop.f32.mrf.mxu0 }
 0x3dc   :  { %v3249_v1 = vmul.f32 %v3173_v0, %v6431_v17  ;;  %v6437_v0 = vld [vmem:[#allocation23_spill] sm:$0xff] }
 0x3dd   :  { %v3244_v56 = vpop.f32.mrf.mxu1  ;;  %v3175_v15 = vpop.f32.mrf.mxu0 }
 0x3de   :  { %v3251_v32 = vmul.f32 %v3244_v56, %v6433_v44  ;;  %v3250_v35 = vmul.f32 %v3175_v15, %v6434_v19  ;;  %v3253_v13 = vadd.f32 %v3249_v1, %v3050_v12  ;;  %v6441_v15 = vld [vmem:[#allocation27_spill] sm:$0xff] }
 0x3df   :  { %v3246_v59 = vpop.f32.mrf.mxu1 }
 0x3e0   :  { %v3252_v33 = vmul.f32 %v3246_v59, %v6436_v2  ;;  %v3255_v31 = vadd.f32 %v3251_v32, %v3052_v41  ;;  %v3254_v25 = vadd.f32 %v3250_v35, %v3051_v38  ;;  %v6443_v59 = vld [vmem:[#allocation30_spill] sm:$0xff]  ;;  %v4368_v35 = vld [vmem:[%s6209_s4 + $0x38] ss:$0 sm:$0xff]  ;;  %v6448_v2 = vld [vmem:[#allocation3_spill] sm:$0xff] }
 0x3e2   :  { %v3256_v47 = vadd.f32 %v3252_v33, %v3053_v37 }
 0x3e5   :  { %v3376_v49 = vpop.f32.mrf.mxu0 }
 0x3e6   :  { %v3452_v54 = vmul.f32 %v3376_v49, %v6435_v58 }
 0x3e7   :  { %v3447_v27 = vpop.f32.mrf.mxu1  ;;  %v3378_v52 = vpop.f32.mrf.mxu0 }
 0x3e8   :  { %v3454_v28 = vmul.f32 %v3447_v27, %v6437_v0  ;;  %v3453_v4 = vmul.f32 %v3378_v52, %v6438_v57  ;;  %v3456_v61 = vadd.f32 %v3452_v54, %v3253_v13 }
 0x3e9   :  { %v3449_v11 = vpop.f32.mrf.mxu1 }
 0x3ea   :  { %v3455_v16 = vmul.f32 %v3449_v11, %v6440_v18  ;;  %v3458_v63 = vadd.f32 %v3454_v28, %v3255_v31  ;;  %v3457_v26 = vadd.f32 %v3453_v4, %v3254_v25 }
 0x3ec   :  { %v3459_v30 = vadd.f32 %v3455_v16, %v3256_v47 }
 0x3ef   :  { %v3579_v55 = vpop.f32.mrf.mxu0 }
 0x3f0   :  { %v3655_v56 = vmul.f32 %v3579_v55, %v6439_v10 }
 0x3f1   :  { %v3650_v20 = vpop.f32.mrf.mxu1  ;;  %v3581_v45 = vpop.f32.mrf.mxu0 }
 0x3f2   :  { %v3657_v7 = vmul.f32 %v3650_v20, %v6441_v15  ;;  %v3656_v60 = vmul.f32 %v3581_v45, %v6442_v53  ;;  %v3659_v48 = vadd.f32 %v3655_v56, %v3456_v61 }
 0x3f3   :  { %v3652_v6 = vpop.f32.mrf.mxu1 }
 0x3f4   :  { %v3658_v52 = vmul.f32 %v3652_v6, %v6444_v42  ;;  %v3661_v20 = vadd.f32 %v3657_v7, %v3458_v63  ;;  %v3660_v29 = vadd.f32 %v3656_v60, %v3457_v26 }
 0x3f6   :  { %v3662_v62 = vadd.f32 %v3658_v52, %v3459_v30 }
 0x3f9   :  { %v3782_v34 = vpop.f32.mrf.mxu0 }
 0x3fa   :  { %v3858_v39 = vmul.f32 %v3782_v34, %v6443_v59 }
 0x3fb   :  { %v3853_v36 = vpop.f32.mrf.mxu1  ;;  %v3784_v49 = vpop.f32.mrf.mxu0 }
 0x3fc   :  { %v3860_v55 = vmul.f32 %v3853_v36, %v6445_v8  ;;  %v3859_v11 = vmul.f32 %v3784_v49, %v6446_v51  ;;  %v3862_v45 = vadd.f32 %v3858_v39, %v3659_v48 }
 0x3fd   :  { %v3855_v27 = vpop.f32.mrf.mxu1 }
 0x3fe   :  { %v3861_v24 = vmul.f32 %v3855_v27, %v6447_v5  ;;  %v3864_v40 = vadd.f32 %v3860_v55, %v3661_v20  ;;  %v3863_v6 = vadd.f32 %v3859_v11, %v3660_v29 }
 0x400   :  { %v3865_v32 = vadd.f32 %v3861_v24, %v3662_v62 }
 0x403   :  { %v3985_v9 = vpop.f32.mrf.mxu0 }
 0x404   :  { %v4061_v50 = vmul.f32 %v4365_v43, %v3985_v9 }
 0x405   :  { %v3987_v17 = vpop.f32.mrf.mxu0  ;;  %v4056_v1 = vpop.f32.mrf.mxu1 }
 0x406   :  { %v4065_v3 = vadd.f32 %v4061_v50, %v3862_v45  ;;  %v4062_v23 = vmul.f32 %v4366_v21, %v3987_v17  ;;  %v4063_v44 = vmul.f32 %v4367_v14, %v4056_v1 }
 0x407   :  { %v4058_v34 = vpop.f32.mrf.mxu1 }
 0x408   :  { %v4073_v46 = vrot.slane %v4065_v3, 1  ;;  %4155 = vst [vmem:[%s6213_s5] sm:$0xfc] %v4065_v3  ;;  %v4066_v12 = vadd.f32 %v4062_v23, %v3863_v6  ;;  %v4067_v19 = vadd.f32 %v4063_v44, %v3864_v40  ;;  %v4064_v58 = vmul.f32 %v4368_v35, %v4058_v34 }
 0x40a   :  { %v4081_v54 = vmax.f32 %v4065_v3, %v4073_v46  ;;  %v4074_v36 = vrot.slane %v4066_v12, 1  ;;  %4156 = vst [vmem:[%s6213_s5 + $0x8] sm:$0xfc] %v4066_v12  ;;  %v4075_v22 = vrot.slane %v4067_v19, 1  ;;  %4338 = vst [vmem:[%s6213_s5 + $0x10] sm:$0xfc] %v4067_v19  ;;  %v4068_v41 = vadd.f32 %v4064_v58, %v3865_v32 }
 0x40c   :  { %v4088_v33 = vrot.slane %v4081_v54, %v6448_v2  ;;  %v4082_v0 = vmax.f32 %v4066_v12, %v4074_v36  ;;  %v4083_v28 = vmax.f32 %v4067_v19, %v4075_v22  ;;  %v4076_v38 = vrot.slane %v4068_v41, 1  ;;  %4339 = vst [vmem:[%s6213_s5 + $0x18] sm:$0xfc] %v4068_v41 }
 0x40e   :  { %v4101_v13 = vsub.f32 %v4065_v3, %v4088_v33  ;;  %v4092_v57 = vrot.slane %v4082_v0, %v6448_v2  ;;  %v4096_v4 = vrot.slane %v4083_v28, %v6448_v2  ;;  %v4084_v10 = vmax.f32 %v4068_v41, %v4076_v38 }
 0x410   :  { %v4105_v56 = vmul.f32 1.442695, %v4101_v13  ;;  %v4102_v37 = vsub.f32 %v4066_v12, %v4092_v57  ;;  %v4103_v31 = vsub.f32 %v4067_v19, %v4096_v4  ;;  %v4100_v18 = vrot.slane %v4084_v10, %v6448_v2 }
 0x412   :  { %4349 = vpow2.f32 %v4105_v56  ;;  %v4107_v16 = vmul.f32 1.442695, %v4102_v37  ;;  %v4109_v15 = vmul.f32 1.442695, %v4103_v31  ;;  %v4104_v7 = vsub.f32 %v4068_v41, %v4100_v18 }
 0x414   :  { %4351 = vpow2.f32 %v4107_v16  ;;  %v4111_v49 = vmul.f32 1.442695, %v4104_v7 }
 0x415   :  { %4353 = vpow2.f32 %v4109_v15 }
 0x416   :  { %4355 = vpow2.f32 %v4111_v49 }
 0x41f   :  { %v4350_v25 = vpop.eup %4349 }
 0x420   :  { %v4117_v61 = vrot.slane %v4350_v25, 1 }
 0x421   :  { %v4352_v53 = vpop.eup %4351 }
 0x422   :  { %v4354_v60 = vpop.eup %4353  ;;  %v4125_v59 = vadd.f32 %v4350_v25, %v4117_v61  ;;  %v4118_v39 = vrot.slane %v4352_v53, 1 }
 0x423   :  { %v4356_v27 = vpop.eup %4355  ;;  %v4119_v47 = vrot.slane %v4354_v60, 1 }
 0x424   :  { %4357 = vrcp.f32 %v4125_v59  ;;  %v4126_v63 = vadd.f32 %v4352_v53, %v4118_v39  ;;  %v4120_v42 = vrot.slane %v4356_v27, 1 }
 0x425   :  { %v4127_v52 = vadd.f32 %v4354_v60, %v4119_v47 }
 0x426   :  { %4359 = vrcp.f32 %v4126_v63  ;;  %v4128_v8 = vadd.f32 %v4356_v27, %v4120_v42 }
 0x427   :  { %4361 = vrcp.f32 %v4127_v52 }
 0x428   :  { %4363 = vrcp.f32 %v4128_v8 }
 0x431   :  { %v4358_v55 = vpop.eup %4357 }
 0x432   :  { %v4136_v26 = vrot.slane %v4358_v55, %v6448_v2 }
 0x433   :  { %v4360_v48 = vpop.eup %4359 }
 0x434   :  { %v4362_v51 = vpop.eup %4361  ;;  %v4149_v11 = vmul.f32 %v4350_v25, %v4136_v26  ;;  %v4140_v30 = vrot.slane %v4360_v48, %v6448_v2 }
 0x435   :  { %v4364_v20 = vpop.eup %4363  ;;  %v4144_v5 = vrot.slane %v4362_v51, %v6448_v2 }
 0x436   :  { %4153 = vst [vmem:[%s6213_s5] sm:$0x3] %v4149_v11  ;;  %v4150_v24 = vmul.f32 %v4352_v53, %v4140_v30  ;;  %v4148_v9 = vrot.slane %v4364_v20, %v6448_v2 }
 0x437   :  { %v4151_v29 = vmul.f32 %v4354_v60, %v4144_v5 }
 0x438   :  { %4154 = vst [vmem:[%s6213_s5 + $0x8] sm:$0x3] %v4150_v24  ;;  %v4152_v45 = vmul.f32 %v4356_v27, %v4148_v9 }
 0x439   :  { %4336 = vst [vmem:[%s6213_s5 + $0x10] sm:$0x3] %v4151_v29 }
 0x43a   :  { %4337 = vst [vmem:[%s6213_s5 + $0x18] sm:$0x3] %v4152_v45 }

</bundles_post_ra>
